<compile_context>
chip_gen: v7x
topology: tpu7x:2x2x1
jax: 0.10.0
libtpu: 0.0.40
codegen_flags: <defaults>
</compile_context>

<pallas_src>
import functools

import jax
import jax.numpy as jnp
import numpy as np
from jax.experimental import pallas as pl
from jax.experimental.pallas import tpu as pltpu


def _cross_attn_kernel(*refs, N, H, DH, compute_dtype):
    """One batch tile of fused multimodal cross-attention (length-1 query per modality).

    refs layout:
      refs[0:N]   x_i   (TB, C)     per-modality input tiles (any float dtype, cast in-kernel)
      refs[N+0]   wqkv  (C, 3C)     fused [Wq*scale | Wk | Wv]^T, compute_dtype, resident
      refs[N+1]   bqkv  (1, 3C)     fused [bq*scale | bk | bv], f32
      refs[N+2]   wo    (C, C)      Wo^T, compute_dtype, resident
      refs[N+3]   bo    (1, C)      f32
      refs[N+4]   out   (TB, N*C)   fused embedding tile (lane-dense final layout)
      refs[N+5]   qkv   (N*TB, 3C)  VMEM scratch for q/k/v of all modalities, compute_dtype
    """
    x_refs = refs[:N]
    wqkv_ref, bqkv_ref, wo_ref, bo_ref = refs[N:N + 4]
    out_ref = refs[N + 4]
    qkv_ref = refs[N + 5]

    C = H * DH
    f32 = jnp.float32
    TB = x_refs[0].shape[0]
    # approx reciprocal only on the bf16 path (~2^-12 rel. err; denom >= 1 so safe).
    approx = compute_dtype != jnp.float32

    # ---- fused QKV projection: one MXU pass for all N modalities -------------------
    xs = jnp.concatenate([x_refs[i][...].astype(compute_dtype) for i in range(N)], axis=0)
    qkv = jnp.dot(xs, wqkv_ref[...], preferred_element_type=f32) + bqkv_ref[...]
    qkv_ref[...] = qkv.astype(qkv_ref.dtype)

    # ---- per-head segmented all-reduce over the DH lanes of each head (XLU path) ---
    lane_in_head = jax.lax.broadcasted_iota(jnp.int32, (TB, C), 1) & (DH - 1)

    def seg_roll(x, sft):
        # cyclic roll by `sft` *within* each aligned DH-lane head segment
        return jnp.where(lane_in_head >= sft,
                         pltpu.roll(x, sft, axis=1),
                         pltpu.roll(x, (C + sft - DH) % C, axis=1))

    def head_allreduce(x):
        # log2(DH) butterfly: every lane ends up holding its head's sum (f32, XLU slots)
        sft = 1
        while sft < DH:
            x = x + seg_roll(x, sft)
            sft *= 2
        return x

    def q_of(i):  # (TB, C) f32; 1/sqrt(DH) already folded into Wq/bq at prepare time
        return qkv_ref[i * TB:(i + 1) * TB, 0:C].astype(f32)

    def k_of(j):
        return qkv_ref[j * TB:(j + 1) * TB, C:2 * C].astype(f32)

    def v_of(j):
        return qkv_ref[j * TB:(j + 1) * TB, 2 * C:3 * C].astype(f32)

    wo = wo_ref[...]
    bo = bo_ref[...]

    # ---- per query-modality attention: softmax over the N modalities ---------------
    for i in range(N):
        qi = q_of(i)
        # scores: per-head <q_i, k_j>, already broadcast across each head's DH lanes.
        # Product and reduction stay f32 (the q*k product is the precision-sensitive term).
        s = [head_allreduce(qi * k_of(j)) for j in range(N)]
        m = s[0]
        for j in range(1, N):
            m = jnp.maximum(m, s[j])
        e = [jnp.exp(s[j] - m) for j in range(N)]
        denom = e[0]
        for j in range(1, N):
            denom = denom + e[j]
        inv = pl.reciprocal(denom, approx=approx)                    # EUP slot

        # context accumulates lane-dense (TB, C) in registers: no 32-lane sub-slices,
        # no masked per-head stores, no VMEM round trip.
        ctx = (e[0] * inv) * v_of(0)
        for j in range(1, N):
            ctx = ctx + (e[j] * inv) * v_of(j)

        # output projection: one full-C MXU contraction, lane-dense store into final slot
        o_i = jnp.dot(ctx.astype(compute_dtype), wo, preferred_element_type=f32) + bo
        out_ref[:, i * C:(i + 1) * C] = o_i.astype(out_ref.dtype)


def prepare_params(params, nhead, compute_dtype=jnp.bfloat16):
    """One-time packing of the MHA parameters into the kernel layout
    (pre-transposed, QKV-fused, biases as (1,.) rows, 1/sqrt(DH) folded into Wq/bq)."""
    wq, wk, wv, bq, bk, bv, wo, bo = params
    C = wq.shape[0]
    assert C % nhead == 0
    DH = C // nhead
    assert DH & (DH - 1) == 0, "head_dim must be a power of two (XLU butterfly reduction)"
    scale = 1.0 / np.sqrt(DH)
    wqkv = jnp.concatenate([wq.T * scale, wk.T, wv.T], axis=1).astype(compute_dtype)  # (C,3C)
    bqkv = jnp.concatenate([bq * scale, bk, bv]).reshape(1, 3 * C).astype(jnp.float32)
    wo_t = wo.T.astype(compute_dtype)                                                 # (C, C)
    bo_r = bo.reshape(1, C).astype(jnp.float32)
    return wqkv, bqkv, wo_t, bo_r


def _pick_tb(B, block_b):
    """Batch tile: as large as requested, sublane-aligned, but keep >= 2 grid tiles so the
    'parallel' grid axis feeds both TensorCores on v7x."""
    tb = max(8, min(block_b, B))
    if B > 8 and pl.cdiv(B, tb) < 2:
        tb = pl.cdiv(B, 2)
    return pl.cdiv(tb, 8) * 8


def cross_attention_v2(mod_features, prepared, nhead, *, block_b=512,
                       compute_dtype=jnp.bfloat16, out_dtype=None):
    """mod_features: list of N arrays (B, C). Returns the fused (B, N*C) embedding."""
    N = len(mod_features)
    B, C = mod_features[0].shape
    assert C % nhead == 0
    DH = C // nhead
    assert C % 128 == 0, "d_model must be a multiple of 128 for lane-dense slicing"
    assert DH & (DH - 1) == 0, "head_dim must be a power of two (XLU butterfly reduction)"
    wqkv, bqkv, wo_t, bo_r = prepared
    if out_dtype is None:
        out_dtype = compute_dtype

    TB = _pick_tb(B, block_b)
    Bp = pl.cdiv(B, TB) * TB
    xs = list(mod_features)
    if Bp != B:
        # rare fallback; TB is normally chosen so this is a no-op
        xs = [jnp.pad(x, ((0, Bp - B), (0, 0))) for x in xs]

    kernel = functools.partial(_cross_attn_kernel, N=N, H=nhead, DH=DH,
                               compute_dtype=compute_dtype)

    # VMEM budget: qkv scratch + double-buffered input/output tiles + resident weights.
    cb = jnp.dtype(compute_dtype).itemsize
    ib = jnp.dtype(mod_features[0].dtype).itemsize
    ob = jnp.dtype(out_dtype).itemsize
    est = (N * TB * 3 * C * cb
           + 2 * N * TB * C * ib
           + 2 * TB * N * C * ob
           + 2 * (wqkv.size * cb + wo_t.size * cb + bqkv.size * 4 + bo_r.size * 4))
    vmem_limit = int(min(max(4 * est, 16 * 2**20), 64 * 2**20))

    x_spec = pl.BlockSpec((TB, C), lambda b: (b, 0))
    w_specs = [pl.BlockSpec(w.shape, lambda b: (0, 0))
               for w in (wqkv, bqkv, wo_t, bo_r)]
    # TODO(synk): for very large d_model, single-buffer the resident weights
    # (pipeline_mode=pl.Buffered(1)) and K-tile the projections instead of full residency.

    out = pl.pallas_call(
        kernel,
        out_shape=jax.ShapeDtypeStruct((Bp, N * C), out_dtype),
        grid=(Bp // TB,),
        in_specs=[x_spec] * N + w_specs,
        out_specs=pl.BlockSpec((TB, N * C), lambda b: (b, 0)),
        scratch_shapes=[pltpu.VMEM((N * TB, 3 * C), compute_dtype)],
        compiler_params=pltpu.CompilerParams(
            dimension_semantics=("parallel",),        # shard batch tiles across v7x TCs
            vmem_limit_bytes=vmem_limit),
    )(*xs, wqkv, bqkv, wo_t, bo_r)

    return out[:B] if Bp != B else out


def cross_attention_v2_ref(mod_features, params, nhead):
    """Pure-JAX reference mirroring torch.nn.MultiheadAttention forward."""
    N = len(mod_features)
    B, C = mod_features[0].shape
    dh = C // nhead
    wq, wk, wv, bq, bk, bv, wo, bo = params

    kv = jnp.stack(mod_features, axis=0)                      # (N, B, C)
    q = kv @ wq.T + bq
    k = kv @ wk.T + bk
    v = kv @ wv.T + bv
    qh = q.reshape(N, B, nhead, dh)
    kh = k.reshape(N, B, nhead, dh)
    vh = v.reshape(N, B, nhead, dh)
    s = jnp.einsum('ibhd,jbhd->ibhj', qh, kh) / np.sqrt(dh)
    p = jax.nn.softmax(s, axis=-1)
    ctx = jnp.einsum('ibhj,jbhd->ibhd', p, vh).reshape(N, B, C)
    out = ctx @ wo.T + bo                                      # (N, B, C)
    return out.transpose(1, 0, 2).reshape(B, N * C)


def init_params(key, d_model):
    ks = jax.random.split(key, 8)
    scale = 1.0 / np.sqrt(d_model)
    wq = jax.random.normal(ks[0], (d_model, d_model), jnp.float32) * scale
    wk = jax.random.normal(ks[1], (d_model, d_model), jnp.float32) * scale
    wv = jax.random.normal(ks[2], (d_model, d_model), jnp.float32) * scale
    wo = jax.random.normal(ks[3], (d_model, d_model), jnp.float32) * scale
    bq = jax.random.normal(ks[4], (d_model,), jnp.float32) * 0.01
    bk = jax.random.normal(ks[5], (d_model,), jnp.float32) * 0.01
    bv = jax.random.normal(ks[6], (d_model,), jnp.float32) * 0.01
    bo = jax.random.normal(ks[7], (d_model,), jnp.float32) * 0.01
    return (wq, wk, wv, bq, bk, bv, wo, bo)


if __name__ == "__main__":
    d_model = 128     # C (lane-aligned)
    nhead = 4         # -> DH = 32 (power of two)
    B = 16            # batch
    N = 3             # number of modalities

    key = jax.random.PRNGKey(0)
    pkey, *fkeys = jax.random.split(key, N + 1)

    params = init_params(pkey, d_model)
    mod_features = [jax.random.normal(fk, (B, d_model), jnp.float32) for fk in fkeys]

    ref = cross_attention_v2_ref(mod_features, params, nhead)

    # 1) f32 compute path: tight algorithmic correctness check (exact reciprocal, f32 math).
    prep32 = prepare_params(params, nhead, compute_dtype=jnp.float32)
    out32 = cross_attention_v2(mod_features, prep32, nhead,
                               compute_dtype=jnp.float32, out_dtype=jnp.float32)
    out32 = jax.block_until_ready(out32)
    assert out32.shape == (B, N * d_model)
    np.testing.assert_allclose(np.asarray(out32), np.asarray(ref), rtol=2e-5, atol=2e-5)

    # 2) bf16 production path (bf16 MXU operands, bf16 output, approx reciprocal):
    #    loose sanity bound; the algorithm is tightly validated by the f32 path above.
    prep16 = prepare_params(params, nhead, compute_dtype=jnp.bfloat16)
    out16 = cross_attention_v2(mod_features, prep16, nhead,
                               compute_dtype=jnp.bfloat16)
    out16 = jax.block_until_ready(out16)
    assert out16.shape == (B, N * d_model)
    np.testing.assert_allclose(np.asarray(out16.astype(jnp.float32)), np.asarray(ref),
                               rtol=1e-1, atol=1e-1)

    print("KERNEL_OK")
</pallas_src>

<mosaic_0001>
module attributes {stable_mosaic.version = 11 : i64} {
  func.func @_cross_attn_kernel(%arg0: i32, %arg1: memref<8x128xf32, #tpu.memory_space<vmem>>, %arg2: memref<8x128xf32, #tpu.memory_space<vmem>>, %arg3: memref<8x128xf32, #tpu.memory_space<vmem>>, %arg4: memref<128x384xf32, #tpu.memory_space<vmem>>, %arg5: memref<1x384xf32, #tpu.memory_space<vmem>>, %arg6: memref<128x128xf32, #tpu.memory_space<vmem>>, %arg7: memref<1x128xf32, #tpu.memory_space<vmem>>, %arg8: memref<8x384xf32, #tpu.memory_space<vmem>>, %arg9: memref<24x384xf32, #tpu.memory_space<vmem>>) attributes {dimension_semantics = [#tpu.dimension_semantics<parallel>], iteration_bounds = array<i64: 2>, scalar_prefetch = 0 : i64, scratch_operands = 1 : i64, tpu.core_type = #tpu.core_type<tc>, window_params = [{transform_indices = @transform_0, window_bounds = array<i64: 8, 128>}, {transform_indices = @transform_1, window_bounds = array<i64: 8, 128>}, {transform_indices = @transform_2, window_bounds = array<i64: 8, 128>}, {pipeline_mode = #tpu.pipeline_mode<synchronous>, transform_indices = @transform_3, window_bounds = array<i64: 128, 384>}, {pipeline_mode = #tpu.pipeline_mode<synchronous>, transform_indices = @transform_4, window_bounds = array<i64: 1, 384>}, {pipeline_mode = #tpu.pipeline_mode<synchronous>, transform_indices = @transform_5, window_bounds = array<i64: 128, 128>}, {pipeline_mode = #tpu.pipeline_mode<synchronous>, transform_indices = @transform_6, window_bounds = array<i64: 1, 128>}, {transform_indices = @transform_7, window_bounds = array<i64: 8, 384>}]} {
    %c0 = arith.constant 0 : index
    %c0_0 = arith.constant 0 : index
    %0 = vector.load %arg1[%c0, %c0_0] : memref<8x128xf32, #tpu.memory_space<vmem>>, vector<8x128xf32>
    %c0_1 = arith.constant 0 : index
    %c0_2 = arith.constant 0 : index
    %1 = vector.load %arg2[%c0_1, %c0_2] : memref<8x128xf32, #tpu.memory_space<vmem>>, vector<8x128xf32>
    %c0_3 = arith.constant 0 : index
    %c0_4 = arith.constant 0 : index
    %2 = vector.load %arg3[%c0_3, %c0_4] : memref<8x128xf32, #tpu.memory_space<vmem>>, vector<8x128xf32>
    %3 = tpu.concatenate %0, %1, %2 in 0 : vector<8x128xf32>, vector<8x128xf32>, vector<8x128xf32> -> vector<24x128xf32>
    %c0_5 = arith.constant 0 : index
    %c0_6 = arith.constant 0 : index
    %4 = vector.load %arg4[%c0_5, %c0_6] : memref<128x384xf32, #tpu.memory_space<vmem>>, vector<128x384xf32>
    %cst = arith.constant dense<0.000000e+00> : vector<24x384xf32>
    %5 = tpu.matmul %3, %4, %cst {dimension_numbers = #tpu.dot_dimension_numbers<[1], [0], [0], [1], [0, 0, 1, 1], [], []>} : vector<24x128xf32>, vector<128x384xf32>, vector<24x384xf32> -> vector<24x384xf32>
    %c0_7 = arith.constant 0 : index
    %c0_8 = arith.constant 0 : index
    %6 = vector.load %arg5[%c0_7, %c0_8] : memref<1x384xf32, #tpu.memory_space<vmem>>, vector<1x384xf32>
    %7 = vector.broadcast %6 : vector<1x384xf32> to vector<24x384xf32>
    %8 = arith.addf %5, %7 : vector<24x384xf32>
    %c0_9 = arith.constant 0 : index
    %c0_10 = arith.constant 0 : index
    %9 = vector.load %arg9[%c0_9, %c0_10] : memref<24x384xf32, #tpu.memory_space<vmem>>, vector<24x384xf32>
    tpu.vector_store %arg9[%c0_9, %c0_10], %8 {strides = array<i32>} : memref<24x384xf32, #tpu.memory_space<vmem>>, vector<24x384xf32>,
    %10 = tpu.iota {dimensions = array<i32: 1>} : vector<8x128xi32>
    %c31_i32 = arith.constant 31 : i32
    %11 = vector.broadcast %c31_i32 : i32 to vector<8x128xi32>
    %12 = arith.andi %10, %11 : vector<8x128xi32>
    %c0_11 = arith.constant 0 : index
    %c0_12 = arith.constant 0 : index
    %13 = vector.load %arg6[%c0_11, %c0_12] : memref<128x128xf32, #tpu.memory_space<vmem>>, vector<128x128xf32>
    %c0_13 = arith.constant 0 : index
    %c0_14 = arith.constant 0 : index
    %14 = vector.load %arg7[%c0_13, %c0_14] : memref<1x128xf32, #tpu.memory_space<vmem>>, vector<1x128xf32>
    %c0_15 = arith.constant 0 : index
    %c0_16 = arith.constant 0 : index
    %15 = vector.load %arg9[%c0_15, %c0_16] : memref<24x384xf32, #tpu.memory_space<vmem>>, vector<8x128xf32>
    %c0_17 = arith.constant 0 : index
    %c128 = arith.constant 128 : index
    %16 = vector.load %arg9[%c0_17, %c128] : memref<24x384xf32, #tpu.memory_space<vmem>>, vector<8x128xf32>
    %17 = arith.mulf %15, %16 : vector<8x128xf32>
    %c1_i32 = arith.constant 1 : i32
    %18 = vector.broadcast %c1_i32 : i32 to vector<8x128xi32>
    %19 = arith.cmpi sge, %12, %18 : vector<8x128xi32>
    %c1_i32_18 = arith.constant 1 : i32
    %20 = tpu.dynamic_rotate %17 by %c1_i32_18 dim 1 : vector<8x128xf32>, i32 -> vector<8x128xf32>
    %c97_i32 = arith.constant 97 : i32
    %21 = tpu.dynamic_rotate %17 by %c97_i32 dim 1 : vector<8x128xf32>, i32 -> vector<8x128xf32>
    %22 = arith.select %19, %20, %21 : vector<8x128xi1>, vector<8x128xf32>
    %23 = arith.addf %17, %22 : vector<8x128xf32>
    %c2_i32 = arith.constant 2 : i32
    %24 = vector.broadcast %c2_i32 : i32 to vector<8x128xi32>
    %25 = arith.cmpi sge, %12, %24 : vector<8x128xi32>
    %c2_i32_19 = arith.constant 2 : i32
    %26 = tpu.dynamic_rotate %23 by %c2_i32_19 dim 1 : vector<8x128xf32>, i32 -> vector<8x128xf32>
    %c98_i32 = arith.constant 98 : i32
    %27 = tpu.dynamic_rotate %23 by %c98_i32 dim 1 : vector<8x128xf32>, i32 -> vector<8x128xf32>
    %28 = arith.select %25, %26, %27 : vector<8x128xi1>, vector<8x128xf32>
    %29 = arith.addf %23, %28 : vector<8x128xf32>
    %c4_i32 = arith.constant 4 : i32
    %30 = vector.broadcast %c4_i32 : i32 to vector<8x128xi32>
    %31 = arith.cmpi sge, %12, %30 : vector<8x128xi32>
    %c4_i32_20 = arith.constant 4 : i32
    %32 = tpu.dynamic_rotate %29 by %c4_i32_20 dim 1 : vector<8x128xf32>, i32 -> vector<8x128xf32>
    %c100_i32 = arith.constant 100 : i32
    %33 = tpu.dynamic_rotate %29 by %c100_i32 dim 1 : vector<8x128xf32>, i32 -> vector<8x128xf32>
    %34 = arith.select %31, %32, %33 : vector<8x128xi1>, vector<8x128xf32>
    %35 = arith.addf %29, %34 : vector<8x128xf32>
    %c8_i32 = arith.constant 8 : i32
    %36 = vector.broadcast %c8_i32 : i32 to vector<8x128xi32>
    %37 = arith.cmpi sge, %12, %36 : vector<8x128xi32>
    %c8_i32_21 = arith.constant 8 : i32
    %38 = tpu.dynamic_rotate %35 by %c8_i32_21 dim 1 : vector<8x128xf32>, i32 -> vector<8x128xf32>
    %c104_i32 = arith.constant 104 : i32
    %39 = tpu.dynamic_rotate %35 by %c104_i32 dim 1 : vector<8x128xf32>, i32 -> vector<8x128xf32>
    %40 = arith.select %37, %38, %39 : vector<8x128xi1>, vector<8x128xf32>
    %41 = arith.addf %35, %40 : vector<8x128xf32>
    %c16_i32 = arith.constant 16 : i32
    %42 = vector.broadcast %c16_i32 : i32 to vector<8x128xi32>
    %43 = arith.cmpi sge, %12, %42 : vector<8x128xi32>
    %c16_i32_22 = arith.constant 16 : i32
    %44 = tpu.dynamic_rotate %41 by %c16_i32_22 dim 1 : vector<8x128xf32>, i32 -> vector<8x128xf32>
    %c112_i32 = arith.constant 112 : i32
    %45 = tpu.dynamic_rotate %41 by %c112_i32 dim 1 : vector<8x128xf32>, i32 -> vector<8x128xf32>
    %46 = arith.select %43, %44, %45 : vector<8x128xi1>, vector<8x128xf32>
    %47 = arith.addf %41, %46 : vector<8x128xf32>
    %c8 = arith.constant 8 : index
    %c128_23 = arith.constant 128 : index
    %48 = vector.load %arg9[%c8, %c128_23] : memref<24x384xf32, #tpu.memory_space<vmem>>, vector<8x128xf32>
    %49 = arith.mulf %15, %48 : vector<8x128xf32>
    %c1_i32_24 = arith.constant 1 : i32
    %50 = vector.broadcast %c1_i32_24 : i32 to vector<8x128xi32>
    %51 = arith.cmpi sge, %12, %50 : vector<8x128xi32>
    %c1_i32_25 = arith.constant 1 : i32
    %52 = tpu.dynamic_rotate %49 by %c1_i32_25 dim 1 : vector<8x128xf32>, i32 -> vector<8x128xf32>
    %c97_i32_26 = arith.constant 97 : i32
    %53 = tpu.dynamic_rotate %49 by %c97_i32_26 dim 1 : vector<8x128xf32>, i32 -> vector<8x128xf32>
    %54 = arith.select %51, %52, %53 : vector<8x128xi1>, vector<8x128xf32>
    %55 = arith.addf %49, %54 : vector<8x128xf32>
    %c2_i32_27 = arith.constant 2 : i32
    %56 = vector.broadcast %c2_i32_27 : i32 to vector<8x128xi32>
    %57 = arith.cmpi sge, %12, %56 : vector<8x128xi32>
    %c2_i32_28 = arith.constant 2 : i32
    %58 = tpu.dynamic_rotate %55 by %c2_i32_28 dim 1 : vector<8x128xf32>, i32 -> vector<8x128xf32>
    %c98_i32_29 = arith.constant 98 : i32
    %59 = tpu.dynamic_rotate %55 by %c98_i32_29 dim 1 : vector<8x128xf32>, i32 -> vector<8x128xf32>
    %60 = arith.select %57, %58, %59 : vector<8x128xi1>, vector<8x128xf32>
    %61 = arith.addf %55, %60 : vector<8x128xf32>
    %c4_i32_30 = arith.constant 4 : i32
    %62 = vector.broadcast %c4_i32_30 : i32 to vector<8x128xi32>
    %63 = arith.cmpi sge, %12, %62 : vector<8x128xi32>
    %c4_i32_31 = arith.constant 4 : i32
    %64 = tpu.dynamic_rotate %61 by %c4_i32_31 dim 1 : vector<8x128xf32>, i32 -> vector<8x128xf32>
    %c100_i32_32 = arith.constant 100 : i32
    %65 = tpu.dynamic_rotate %61 by %c100_i32_32 dim 1 : vector<8x128xf32>, i32 -> vector<8x128xf32>
    %66 = arith.select %63, %64, %65 : vector<8x128xi1>, vector<8x128xf32>
    %67 = arith.addf %61, %66 : vector<8x128xf32>
    %c8_i32_33 = arith.constant 8 : i32
    %68 = vector.broadcast %c8_i32_33 : i32 to vector<8x128xi32>
    %69 = arith.cmpi sge, %12, %68 : vector<8x128xi32>
    %c8_i32_34 = arith.constant 8 : i32
    %70 = tpu.dynamic_rotate %67 by %c8_i32_34 dim 1 : vector<8x128xf32>, i32 -> vector<8x128xf32>
    %c104_i32_35 = arith.constant 104 : i32
    %71 = tpu.dynamic_rotate %67 by %c104_i32_35 dim 1 : vector<8x128xf32>, i32 -> vector<8x128xf32>
    %72 = arith.select %69, %70, %71 : vector<8x128xi1>, vector<8x128xf32>
    %73 = arith.addf %67, %72 : vector<8x128xf32>
    %c16_i32_36 = arith.constant 16 : i32
    %74 = vector.broadcast %c16_i32_36 : i32 to vector<8x128xi32>
    %75 = arith.cmpi sge, %12, %74 : vector<8x128xi32>
    %c16_i32_37 = arith.constant 16 : i32
    %76 = tpu.dynamic_rotate %73 by %c16_i32_37 dim 1 : vector<8x128xf32>, i32 -> vector<8x128xf32>
    %c112_i32_38 = arith.constant 112 : i32
    %77 = tpu.dynamic_rotate %73 by %c112_i32_38 dim 1 : vector<8x128xf32>, i32 -> vector<8x128xf32>
    %78 = arith.select %75, %76, %77 : vector<8x128xi1>, vector<8x128xf32>
    %79 = arith.addf %73, %78 : vector<8x128xf32>
    %c16 = arith.constant 16 : index
    %c128_39 = arith.constant 128 : index
    %80 = vector.load %arg9[%c16, %c128_39] : memref<24x384xf32, #tpu.memory_space<vmem>>, vector<8x128xf32>
    %81 = arith.mulf %15, %80 : vector<8x128xf32>
    %c1_i32_40 = arith.constant 1 : i32
    %82 = vector.broadcast %c1_i32_40 : i32 to vector<8x128xi32>
    %83 = arith.cmpi sge, %12, %82 : vector<8x128xi32>
    %c1_i32_41 = arith.constant 1 : i32
    %84 = tpu.dynamic_rotate %81 by %c1_i32_41 dim 1 : vector<8x128xf32>, i32 -> vector<8x128xf32>
    %c97_i32_42 = arith.constant 97 : i32
    %85 = tpu.dynamic_rotate %81 by %c97_i32_42 dim 1 : vector<8x128xf32>, i32 -> vector<8x128xf32>
    %86 = arith.select %83, %84, %85 : vector<8x128xi1>, vector<8x128xf32>
    %87 = arith.addf %81, %86 : vector<8x128xf32>
    %c2_i32_43 = arith.constant 2 : i32
    %88 = vector.broadcast %c2_i32_43 : i32 to vector<8x128xi32>
    %89 = arith.cmpi sge, %12, %88 : vector<8x128xi32>
    %c2_i32_44 = arith.constant 2 : i32
    %90 = tpu.dynamic_rotate %87 by %c2_i32_44 dim 1 : vector<8x128xf32>, i32 -> vector<8x128xf32>
    %c98_i32_45 = arith.constant 98 : i32
    %91 = tpu.dynamic_rotate %87 by %c98_i32_45 dim 1 : vector<8x128xf32>, i32 -> vector<8x128xf32>
    %92 = arith.select %89, %90, %91 : vector<8x128xi1>, vector<8x128xf32>
    %93 = arith.addf %87, %92 : vector<8x128xf32>
    %c4_i32_46 = arith.constant 4 : i32
    %94 = vector.broadcast %c4_i32_46 : i32 to vector<8x128xi32>
    %95 = arith.cmpi sge, %12, %94 : vector<8x128xi32>
    %c4_i32_47 = arith.constant 4 : i32
    %96 = tpu.dynamic_rotate %93 by %c4_i32_47 dim 1 : vector<8x128xf32>, i32 -> vector<8x128xf32>
    %c100_i32_48 = arith.constant 100 : i32
    %97 = tpu.dynamic_rotate %93 by %c100_i32_48 dim 1 : vector<8x128xf32>, i32 -> vector<8x128xf32>
    %98 = arith.select %95, %96, %97 : vector<8x128xi1>, vector<8x128xf32>
    %99 = arith.addf %93, %98 : vector<8x128xf32>
    %c8_i32_49 = arith.constant 8 : i32
    %100 = vector.broadcast %c8_i32_49 : i32 to vector<8x128xi32>
    %101 = arith.cmpi sge, %12, %100 : vector<8x128xi32>
    %c8_i32_50 = arith.constant 8 : i32
    %102 = tpu.dynamic_rotate %99 by %c8_i32_50 dim 1 : vector<8x128xf32>, i32 -> vector<8x128xf32>
    %c104_i32_51 = arith.constant 104 : i32
    %103 = tpu.dynamic_rotate %99 by %c104_i32_51 dim 1 : vector<8x128xf32>, i32 -> vector<8x128xf32>
    %104 = arith.select %101, %102, %103 : vector<8x128xi1>, vector<8x128xf32>
    %105 = arith.addf %99, %104 : vector<8x128xf32>
    %c16_i32_52 = arith.constant 16 : i32
    %106 = vector.broadcast %c16_i32_52 : i32 to vector<8x128xi32>
    %107 = arith.cmpi sge, %12, %106 : vector<8x128xi32>
    %c16_i32_53 = arith.constant 16 : i32
    %108 = tpu.dynamic_rotate %105 by %c16_i32_53 dim 1 : vector<8x128xf32>, i32 -> vector<8x128xf32>
    %c112_i32_54 = arith.constant 112 : i32
    %109 = tpu.dynamic_rotate %105 by %c112_i32_54 dim 1 : vector<8x128xf32>, i32 -> vector<8x128xf32>
    %110 = arith.select %107, %108, %109 : vector<8x128xi1>, vector<8x128xf32>
    %111 = arith.addf %105, %110 : vector<8x128xf32>
    %112 = arith.maximumf %47, %79 : vector<8x128xf32>
    %113 = arith.maximumf %112, %111 : vector<8x128xf32>
    %114 = arith.subf %47, %113 : vector<8x128xf32>
    %115 = math.exp %114 : vector<8x128xf32>
    %116 = arith.subf %79, %113 : vector<8x128xf32>
    %117 = math.exp %116 : vector<8x128xf32>
    %118 = arith.subf %111, %113 : vector<8x128xf32>
    %119 = math.exp %118 : vector<8x128xf32>
    %120 = arith.addf %115, %117 : vector<8x128xf32>
    %121 = arith.addf %120, %119 : vector<8x128xf32>
    %122 = tpu.reciprocal %121 : vector<8x128xf32> -> vector<8x128xf32>
    %123 = arith.mulf %115, %122 : vector<8x128xf32>
    %c0_55 = arith.constant 0 : index
    %c256 = arith.constant 256 : index
    %124 = vector.load %arg9[%c0_55, %c256] : memref<24x384xf32, #tpu.memory_space<vmem>>, vector<8x128xf32>
    %125 = arith.mulf %123, %124 : vector<8x128xf32>
    %126 = arith.mulf %117, %122 : vector<8x128xf32>
    %c8_56 = arith.constant 8 : index
    %c256_57 = arith.constant 256 : index
    %127 = vector.load %arg9[%c8_56, %c256_57] : memref<24x384xf32, #tpu.memory_space<vmem>>, vector<8x128xf32>
    %128 = arith.mulf %126, %127 : vector<8x128xf32>
    %129 = arith.addf %125, %128 : vector<8x128xf32>
    %130 = arith.mulf %119, %122 : vector<8x128xf32>
    %c16_58 = arith.constant 16 : index
    %c256_59 = arith.constant 256 : index
    %131 = vector.load %arg9[%c16_58, %c256_59] : memref<24x384xf32, #tpu.memory_space<vmem>>, vector<8x128xf32>
    %132 = arith.mulf %130, %131 : vector<8x128xf32>
    %133 = arith.addf %129, %132 : vector<8x128xf32>
    %cst_60 = arith.constant dense<0.000000e+00> : vector<8x128xf32>
    %134 = tpu.matmul %133, %13, %cst_60 {dimension_numbers = #tpu.dot_dimension_numbers<[1], [0], [0], [1], [0, 0, 1, 1], [], []>} : vector<8x128xf32>, vector<128x128xf32>, vector<8x128xf32> -> vector<8x128xf32>
    %135 = vector.broadcast %14 : vector<1x128xf32> to vector<8x128xf32>
    %136 = arith.addf %134, %135 : vector<8x128xf32>
    %c0_61 = arith.constant 0 : index
    %c0_62 = arith.constant 0 : index
    %137 = vector.load %arg8[%c0_61, %c0_62] : memref<8x384xf32, #tpu.memory_space<vmem>>, vector<8x128xf32>
    tpu.vector_store %arg8[%c0_61, %c0_62], %136 {strides = array<i32>} : memref<8x384xf32, #tpu.memory_space<vmem>>, vector<8x128xf32>,
    %c8_63 = arith.constant 8 : index
    %c0_64 = arith.constant 0 : index
    %138 = vector.load %arg9[%c8_63, %c0_64] : memref<24x384xf32, #tpu.memory_space<vmem>>, vector<8x128xf32>
    %c0_65 = arith.constant 0 : index
    %c128_66 = arith.constant 128 : index
    %139 = vector.load %arg9[%c0_65, %c128_66] : memref<24x384xf32, #tpu.memory_space<vmem>>, vector<8x128xf32>
    %140 = arith.mulf %138, %139 : vector<8x128xf32>
    %c1_i32_67 = arith.constant 1 : i32
    %141 = vector.broadcast %c1_i32_67 : i32 to vector<8x128xi32>
    %142 = arith.cmpi sge, %12, %141 : vector<8x128xi32>
    %c1_i32_68 = arith.constant 1 : i32
    %143 = tpu.dynamic_rotate %140 by %c1_i32_68 dim 1 : vector<8x128xf32>, i32 -> vector<8x128xf32>
    %c97_i32_69 = arith.constant 97 : i32
    %144 = tpu.dynamic_rotate %140 by %c97_i32_69 dim 1 : vector<8x128xf32>, i32 -> vector<8x128xf32>
    %145 = arith.select %142, %143, %144 : vector<8x128xi1>, vector<8x128xf32>
    %146 = arith.addf %140, %145 : vector<8x128xf32>
    %c2_i32_70 = arith.constant 2 : i32
    %147 = vector.broadcast %c2_i32_70 : i32 to vector<8x128xi32>
    %148 = arith.cmpi sge, %12, %147 : vector<8x128xi32>
    %c2_i32_71 = arith.constant 2 : i32
    %149 = tpu.dynamic_rotate %146 by %c2_i32_71 dim 1 : vector<8x128xf32>, i32 -> vector<8x128xf32>
    %c98_i32_72 = arith.constant 98 : i32
    %150 = tpu.dynamic_rotate %146 by %c98_i32_72 dim 1 : vector<8x128xf32>, i32 -> vector<8x128xf32>
    %151 = arith.select %148, %149, %150 : vector<8x128xi1>, vector<8x128xf32>
    %152 = arith.addf %146, %151 : vector<8x128xf32>
    %c4_i32_73 = arith.constant 4 : i32
    %153 = vector.broadcast %c4_i32_73 : i32 to vector<8x128xi32>
    %154 = arith.cmpi sge, %12, %153 : vector<8x128xi32>
    %c4_i32_74 = arith.constant 4 : i32
    %155 = tpu.dynamic_rotate %152 by %c4_i32_74 dim 1 : vector<8x128xf32>, i32 -> vector<8x128xf32>
    %c100_i32_75 = arith.constant 100 : i32
    %156 = tpu.dynamic_rotate %152 by %c100_i32_75 dim 1 : vector<8x128xf32>, i32 -> vector<8x128xf32>
    %157 = arith.select %154, %155, %156 : vector<8x128xi1>, vector<8x128xf32>
    %158 = arith.addf %152, %157 : vector<8x128xf32>
    %c8_i32_76 = arith.constant 8 : i32
    %159 = vector.broadcast %c8_i32_76 : i32 to vector<8x128xi32>
    %160 = arith.cmpi sge, %12, %159 : vector<8x128xi32>
    %c8_i32_77 = arith.constant 8 : i32
    %161 = tpu.dynamic_rotate %158 by %c8_i32_77 dim 1 : vector<8x128xf32>, i32 -> vector<8x128xf32>
    %c104_i32_78 = arith.constant 104 : i32
    %162 = tpu.dynamic_rotate %158 by %c104_i32_78 dim 1 : vector<8x128xf32>, i32 -> vector<8x128xf32>
    %163 = arith.select %160, %161, %162 : vector<8x128xi1>, vector<8x128xf32>
    %164 = arith.addf %158, %163 : vector<8x128xf32>
    %c16_i32_79 = arith.constant 16 : i32
    %165 = vector.broadcast %c16_i32_79 : i32 to vector<8x128xi32>
    %166 = arith.cmpi sge, %12, %165 : vector<8x128xi32>
    %c16_i32_80 = arith.constant 16 : i32
    %167 = tpu.dynamic_rotate %164 by %c16_i32_80 dim 1 : vector<8x128xf32>, i32 -> vector<8x128xf32>
    %c112_i32_81 = arith.constant 112 : i32
    %168 = tpu.dynamic_rotate %164 by %c112_i32_81 dim 1 : vector<8x128xf32>, i32 -> vector<8x128xf32>
    %169 = arith.select %166, %167, %168 : vector<8x128xi1>, vector<8x128xf32>
    %170 = arith.addf %164, %169 : vector<8x128xf32>
    %c8_82 = arith.constant 8 : index
    %c128_83 = arith.constant 128 : index
    %171 = vector.load %arg9[%c8_82, %c128_83] : memref<24x384xf32, #tpu.memory_space<vmem>>, vector<8x128xf32>
    %172 = arith.mulf %138, %171 : vector<8x128xf32>
    %c1_i32_84 = arith.constant 1 : i32
    %173 = vector.broadcast %c1_i32_84 : i32 to vector<8x128xi32>
    %174 = arith.cmpi sge, %12, %173 : vector<8x128xi32>
    %c1_i32_85 = arith.constant 1 : i32
    %175 = tpu.dynamic_rotate %172 by %c1_i32_85 dim 1 : vector<8x128xf32>, i32 -> vector<8x128xf32>
    %c97_i32_86 = arith.constant 97 : i32
    %176 = tpu.dynamic_rotate %172 by %c97_i32_86 dim 1 : vector<8x128xf32>, i32 -> vector<8x128xf32>
    %177 = arith.select %174, %175, %176 : vector<8x128xi1>, vector<8x128xf32>
    %178 = arith.addf %172, %177 : vector<8x128xf32>
    %c2_i32_87 = arith.constant 2 : i32
    %179 = vector.broadcast %c2_i32_87 : i32 to vector<8x128xi32>
    %180 = arith.cmpi sge, %12, %179 : vector<8x128xi32>
    %c2_i32_88 = arith.constant 2 : i32
    %181 = tpu.dynamic_rotate %178 by %c2_i32_88 dim 1 : vector<8x128xf32>, i32 -> vector<8x128xf32>
    %c98_i32_89 = arith.constant 98 : i32
    %182 = tpu.dynamic_rotate %178 by %c98_i32_89 dim 1 : vector<8x128xf32>, i32 -> vector<8x128xf32>
    %183 = arith.select %180, %181, %182 : vector<8x128xi1>, vector<8x128xf32>
    %184 = arith.addf %178, %183 : vector<8x128xf32>
    %c4_i32_90 = arith.constant 4 : i32
    %185 = vector.broadcast %c4_i32_90 : i32 to vector<8x128xi32>
    %186 = arith.cmpi sge, %12, %185 : vector<8x128xi32>
    %c4_i32_91 = arith.constant 4 : i32
    %187 = tpu.dynamic_rotate %184 by %c4_i32_91 dim 1 : vector<8x128xf32>, i32 -> vector<8x128xf32>
    %c100_i32_92 = arith.constant 100 : i32
    %188 = tpu.dynamic_rotate %184 by %c100_i32_92 dim 1 : vector<8x128xf32>, i32 -> vector<8x128xf32>
    %189 = arith.select %186, %187, %188 : vector<8x128xi1>, vector<8x128xf32>
    %190 = arith.addf %184, %189 : vector<8x128xf32>
    %c8_i32_93 = arith.constant 8 : i32
    %191 = vector.broadcast %c8_i32_93 : i32 to vector<8x128xi32>
    %192 = arith.cmpi sge, %12, %191 : vector<8x128xi32>
    %c8_i32_94 = arith.constant 8 : i32
    %193 = tpu.dynamic_rotate %190 by %c8_i32_94 dim 1 : vector<8x128xf32>, i32 -> vector<8x128xf32>
    %c104_i32_95 = arith.constant 104 : i32
    %194 = tpu.dynamic_rotate %190 by %c104_i32_95 dim 1 : vector<8x128xf32>, i32 -> vector<8x128xf32>
    %195 = arith.select %192, %193, %194 : vector<8x128xi1>, vector<8x128xf32>
    %196 = arith.addf %190, %195 : vector<8x128xf32>
    %c16_i32_96 = arith.constant 16 : i32
    %197 = vector.broadcast %c16_i32_96 : i32 to vector<8x128xi32>
    %198 = arith.cmpi sge, %12, %197 : vector<8x128xi32>
    %c16_i32_97 = arith.constant 16 : i32
    %199 = tpu.dynamic_rotate %196 by %c16_i32_97 dim 1 : vector<8x128xf32>, i32 -> vector<8x128xf32>
    %c112_i32_98 = arith.constant 112 : i32
    %200 = tpu.dynamic_rotate %196 by %c112_i32_98 dim 1 : vector<8x128xf32>, i32 -> vector<8x128xf32>
    %201 = arith.select %198, %199, %200 : vector<8x128xi1>, vector<8x128xf32>
    %202 = arith.addf %196, %201 : vector<8x128xf32>
    %c16_99 = arith.constant 16 : index
    %c128_100 = arith.constant 128 : index
    %203 = vector.load %arg9[%c16_99, %c128_100] : memref<24x384xf32, #tpu.memory_space<vmem>>, vector<8x128xf32>
    %204 = arith.mulf %138, %203 : vector<8x128xf32>
    %c1_i32_101 = arith.constant 1 : i32
    %205 = vector.broadcast %c1_i32_101 : i32 to vector<8x128xi32>
    %206 = arith.cmpi sge, %12, %205 : vector<8x128xi32>
    %c1_i32_102 = arith.constant 1 : i32
    %207 = tpu.dynamic_rotate %204 by %c1_i32_102 dim 1 : vector<8x128xf32>, i32 -> vector<8x128xf32>
    %c97_i32_103 = arith.constant 97 : i32
    %208 = tpu.dynamic_rotate %204 by %c97_i32_103 dim 1 : vector<8x128xf32>, i32 -> vector<8x128xf32>
    %209 = arith.select %206, %207, %208 : vector<8x128xi1>, vector<8x128xf32>
    %210 = arith.addf %204, %209 : vector<8x128xf32>
    %c2_i32_104 = arith.constant 2 : i32
    %211 = vector.broadcast %c2_i32_104 : i32 to vector<8x128xi32>
    %212 = arith.cmpi sge, %12, %211 : vector<8x128xi32>
    %c2_i32_105 = arith.constant 2 : i32
    %213 = tpu.dynamic_rotate %210 by %c2_i32_105 dim 1 : vector<8x128xf32>, i32 -> vector<8x128xf32>
    %c98_i32_106 = arith.constant 98 : i32
    %214 = tpu.dynamic_rotate %210 by %c98_i32_106 dim 1 : vector<8x128xf32>, i32 -> vector<8x128xf32>
    %215 = arith.select %212, %213, %214 : vector<8x128xi1>, vector<8x128xf32>
    %216 = arith.addf %210, %215 : vector<8x128xf32>
    %c4_i32_107 = arith.constant 4 : i32
    %217 = vector.broadcast %c4_i32_107 : i32 to vector<8x128xi32>
    %218 = arith.cmpi sge, %12, %217 : vector<8x128xi32>
    %c4_i32_108 = arith.constant 4 : i32
    %219 = tpu.dynamic_rotate %216 by %c4_i32_108 dim 1 : vector<8x128xf32>, i32 -> vector<8x128xf32>
    %c100_i32_109 = arith.constant 100 : i32
    %220 = tpu.dynamic_rotate %216 by %c100_i32_109 dim 1 : vector<8x128xf32>, i32 -> vector<8x128xf32>
    %221 = arith.select %218, %219, %220 : vector<8x128xi1>, vector<8x128xf32>
    %222 = arith.addf %216, %221 : vector<8x128xf32>
    %c8_i32_110 = arith.constant 8 : i32
    %223 = vector.broadcast %c8_i32_110 : i32 to vector<8x128xi32>
    %224 = arith.cmpi sge, %12, %223 : vector<8x128xi32>
    %c8_i32_111 = arith.constant 8 : i32
    %225 = tpu.dynamic_rotate %222 by %c8_i32_111 dim 1 : vector<8x128xf32>, i32 -> vector<8x128xf32>
    %c104_i32_112 = arith.constant 104 : i32
    %226 = tpu.dynamic_rotate %222 by %c104_i32_112 dim 1 : vector<8x128xf32>, i32 -> vector<8x128xf32>
    %227 = arith.select %224, %225, %226 : vector<8x128xi1>, vector<8x128xf32>
    %228 = arith.addf %222, %227 : vector<8x128xf32>
    %c16_i32_113 = arith.constant 16 : i32
    %229 = vector.broadcast %c16_i32_113 : i32 to vector<8x128xi32>
    %230 = arith.cmpi sge, %12, %229 : vector<8x128xi32>
    %c16_i32_114 = arith.constant 16 : i32
    %231 = tpu.dynamic_rotate %228 by %c16_i32_114 dim 1 : vector<8x128xf32>, i32 -> vector<8x128xf32>
    %c112_i32_115 = arith.constant 112 : i32
    %232 = tpu.dynamic_rotate %228 by %c112_i32_115 dim 1 : vector<8x128xf32>, i32 -> vector<8x128xf32>
    %233 = arith.select %230, %231, %232 : vector<8x128xi1>, vector<8x128xf32>
    %234 = arith.addf %228, %233 : vector<8x128xf32>
    %235 = arith.maximumf %170, %202 : vector<8x128xf32>
    %236 = arith.maximumf %235, %234 : vector<8x128xf32>
    %237 = arith.subf %170, %236 : vector<8x128xf32>
    %238 = math.exp %237 : vector<8x128xf32>
    %239 = arith.subf %202, %236 : vector<8x128xf32>
    %240 = math.exp %239 : vector<8x128xf32>
    %241 = arith.subf %234, %236 : vector<8x128xf32>
    %242 = math.exp %241 : vector<8x128xf32>
    %243 = arith.addf %238, %240 : vector<8x128xf32>
    %244 = arith.addf %243, %242 : vector<8x128xf32>
    %245 = tpu.reciprocal %244 : vector<8x128xf32> -> vector<8x128xf32>
    %246 = arith.mulf %238, %245 : vector<8x128xf32>
    %c0_116 = arith.constant 0 : index
    %c256_117 = arith.constant 256 : index
    %247 = vector.load %arg9[%c0_116, %c256_117] : memref<24x384xf32, #tpu.memory_space<vmem>>, vector<8x128xf32>
    %248 = arith.mulf %246, %247 : vector<8x128xf32>
    %249 = arith.mulf %240, %245 : vector<8x128xf32>
    %c8_118 = arith.constant 8 : index
    %c256_119 = arith.constant 256 : index
    %250 = vector.load %arg9[%c8_118, %c256_119] : memref<24x384xf32, #tpu.memory_space<vmem>>, vector<8x128xf32>
    %251 = arith.mulf %249, %250 : vector<8x128xf32>
    %252 = arith.addf %248, %251 : vector<8x128xf32>
    %253 = arith.mulf %242, %245 : vector<8x128xf32>
    %c16_120 = arith.constant 16 : index
    %c256_121 = arith.constant 256 : index
    %254 = vector.load %arg9[%c16_120, %c256_121] : memref<24x384xf32, #tpu.memory_space<vmem>>, vector<8x128xf32>
    %255 = arith.mulf %253, %254 : vector<8x128xf32>
    %256 = arith.addf %252, %255 : vector<8x128xf32>
    %cst_122 = arith.constant dense<0.000000e+00> : vector<8x128xf32>
    %257 = tpu.matmul %256, %13, %cst_122 {dimension_numbers = #tpu.dot_dimension_numbers<[1], [0], [0], [1], [0, 0, 1, 1], [], []>} : vector<8x128xf32>, vector<128x128xf32>, vector<8x128xf32> -> vector<8x128xf32>
    %258 = vector.broadcast %14 : vector<1x128xf32> to vector<8x128xf32>
    %259 = arith.addf %257, %258 : vector<8x128xf32>
    %c0_123 = arith.constant 0 : index
    %c128_124 = arith.constant 128 : index
    %260 = vector.load %arg8[%c0_123, %c128_124] : memref<8x384xf32, #tpu.memory_space<vmem>>, vector<8x128xf32>
    tpu.vector_store %arg8[%c0_123, %c128_124], %259 {strides = array<i32>} : memref<8x384xf32, #tpu.memory_space<vmem>>, vector<8x128xf32>,
    %c16_125 = arith.constant 16 : index
    %c0_126 = arith.constant 0 : index
    %261 = vector.load %arg9[%c16_125, %c0_126] : memref<24x384xf32, #tpu.memory_space<vmem>>, vector<8x128xf32>
    %c0_127 = arith.constant 0 : index
    %c128_128 = arith.constant 128 : index
    %262 = vector.load %arg9[%c0_127, %c128_128] : memref<24x384xf32, #tpu.memory_space<vmem>>, vector<8x128xf32>
    %263 = arith.mulf %261, %262 : vector<8x128xf32>
    %c1_i32_129 = arith.constant 1 : i32
    %264 = vector.broadcast %c1_i32_129 : i32 to vector<8x128xi32>
    %265 = arith.cmpi sge, %12, %264 : vector<8x128xi32>
    %c1_i32_130 = arith.constant 1 : i32
    %266 = tpu.dynamic_rotate %263 by %c1_i32_130 dim 1 : vector<8x128xf32>, i32 -> vector<8x128xf32>
    %c97_i32_131 = arith.constant 97 : i32
    %267 = tpu.dynamic_rotate %263 by %c97_i32_131 dim 1 : vector<8x128xf32>, i32 -> vector<8x128xf32>
    %268 = arith.select %265, %266, %267 : vector<8x128xi1>, vector<8x128xf32>
    %269 = arith.addf %263, %268 : vector<8x128xf32>
    %c2_i32_132 = arith.constant 2 : i32
    %270 = vector.broadcast %c2_i32_132 : i32 to vector<8x128xi32>
    %271 = arith.cmpi sge, %12, %270 : vector<8x128xi32>
    %c2_i32_133 = arith.constant 2 : i32
    %272 = tpu.dynamic_rotate %269 by %c2_i32_133 dim 1 : vector<8x128xf32>, i32 -> vector<8x128xf32>
    %c98_i32_134 = arith.constant 98 : i32
    %273 = tpu.dynamic_rotate %269 by %c98_i32_134 dim 1 : vector<8x128xf32>, i32 -> vector<8x128xf32>
    %274 = arith.select %271, %272, %273 : vector<8x128xi1>, vector<8x128xf32>
    %275 = arith.addf %269, %274 : vector<8x128xf32>
    %c4_i32_135 = arith.constant 4 : i32
    %276 = vector.broadcast %c4_i32_135 : i32 to vector<8x128xi32>
    %277 = arith.cmpi sge, %12, %276 : vector<8x128xi32>
    %c4_i32_136 = arith.constant 4 : i32
    %278 = tpu.dynamic_rotate %275 by %c4_i32_136 dim 1 : vector<8x128xf32>, i32 -> vector<8x128xf32>
    %c100_i32_137 = arith.constant 100 : i32
    %279 = tpu.dynamic_rotate %275 by %c100_i32_137 dim 1 : vector<8x128xf32>, i32 -> vector<8x128xf32>
    %280 = arith.select %277, %278, %279 : vector<8x128xi1>, vector<8x128xf32>
    %281 = arith.addf %275, %280 : vector<8x128xf32>
    %c8_i32_138 = arith.constant 8 : i32
    %282 = vector.broadcast %c8_i32_138 : i32 to vector<8x128xi32>
    %283 = arith.cmpi sge, %12, %282 : vector<8x128xi32>
    %c8_i32_139 = arith.constant 8 : i32
    %284 = tpu.dynamic_rotate %281 by %c8_i32_139 dim 1 : vector<8x128xf32>, i32 -> vector<8x128xf32>
    %c104_i32_140 = arith.constant 104 : i32
    %285 = tpu.dynamic_rotate %281 by %c104_i32_140 dim 1 : vector<8x128xf32>, i32 -> vector<8x128xf32>
    %286 = arith.select %283, %284, %285 : vector<8x128xi1>, vector<8x128xf32>
    %287 = arith.addf %281, %286 : vector<8x128xf32>
    %c16_i32_141 = arith.constant 16 : i32
    %288 = vector.broadcast %c16_i32_141 : i32 to vector<8x128xi32>
    %289 = arith.cmpi sge, %12, %288 : vector<8x128xi32>
    %c16_i32_142 = arith.constant 16 : i32
    %290 = tpu.dynamic_rotate %287 by %c16_i32_142 dim 1 : vector<8x128xf32>, i32 -> vector<8x128xf32>
    %c112_i32_143 = arith.constant 112 : i32
    %291 = tpu.dynamic_rotate %287 by %c112_i32_143 dim 1 : vector<8x128xf32>, i32 -> vector<8x128xf32>
    %292 = arith.select %289, %290, %291 : vector<8x128xi1>, vector<8x128xf32>
    %293 = arith.addf %287, %292 : vector<8x128xf32>
    %c8_144 = arith.constant 8 : index
    %c128_145 = arith.constant 128 : index
    %294 = vector.load %arg9[%c8_144, %c128_145] : memref<24x384xf32, #tpu.memory_space<vmem>>, vector<8x128xf32>
    %295 = arith.mulf %261, %294 : vector<8x128xf32>
    %c1_i32_146 = arith.constant 1 : i32
    %296 = vector.broadcast %c1_i32_146 : i32 to vector<8x128xi32>
    %297 = arith.cmpi sge, %12, %296 : vector<8x128xi32>
    %c1_i32_147 = arith.constant 1 : i32
    %298 = tpu.dynamic_rotate %295 by %c1_i32_147 dim 1 : vector<8x128xf32>, i32 -> vector<8x128xf32>
    %c97_i32_148 = arith.constant 97 : i32
    %299 = tpu.dynamic_rotate %295 by %c97_i32_148 dim 1 : vector<8x128xf32>, i32 -> vector<8x128xf32>
    %300 = arith.select %297, %298, %299 : vector<8x128xi1>, vector<8x128xf32>
    %301 = arith.addf %295, %300 : vector<8x128xf32>
    %c2_i32_149 = arith.constant 2 : i32
    %302 = vector.broadcast %c2_i32_149 : i32 to vector<8x128xi32>
    %303 = arith.cmpi sge, %12, %302 : vector<8x128xi32>
    %c2_i32_150 = arith.constant 2 : i32
    %304 = tpu.dynamic_rotate %301 by %c2_i32_150 dim 1 : vector<8x128xf32>, i32 -> vector<8x128xf32>
    %c98_i32_151 = arith.constant 98 : i32
    %305 = tpu.dynamic_rotate %301 by %c98_i32_151 dim 1 : vector<8x128xf32>, i32 -> vector<8x128xf32>
    %306 = arith.select %303, %304, %305 : vector<8x128xi1>, vector<8x128xf32>
    %307 = arith.addf %301, %306 : vector<8x128xf32>
    %c4_i32_152 = arith.constant 4 : i32
    %308 = vector.broadcast %c4_i32_152 : i32 to vector<8x128xi32>
    %309 = arith.cmpi sge, %12, %308 : vector<8x128xi32>
    %c4_i32_153 = arith.constant 4 : i32
    %310 = tpu.dynamic_rotate %307 by %c4_i32_153 dim 1 : vector<8x128xf32>, i32 -> vector<8x128xf32>
    %c100_i32_154 = arith.constant 100 : i32
    %311 = tpu.dynamic_rotate %307 by %c100_i32_154 dim 1 : vector<8x128xf32>, i32 -> vector<8x128xf32>
    %312 = arith.select %309, %310, %311 : vector<8x128xi1>, vector<8x128xf32>
    %313 = arith.addf %307, %312 : vector<8x128xf32>
    %c8_i32_155 = arith.constant 8 : i32
    %314 = vector.broadcast %c8_i32_155 : i32 to vector<8x128xi32>
    %315 = arith.cmpi sge, %12, %314 : vector<8x128xi32>
    %c8_i32_156 = arith.constant 8 : i32
    %316 = tpu.dynamic_rotate %313 by %c8_i32_156 dim 1 : vector<8x128xf32>, i32 -> vector<8x128xf32>
    %c104_i32_157 = arith.constant 104 : i32
    %317 = tpu.dynamic_rotate %313 by %c104_i32_157 dim 1 : vector<8x128xf32>, i32 -> vector<8x128xf32>
    %318 = arith.select %315, %316, %317 : vector<8x128xi1>, vector<8x128xf32>
    %319 = arith.addf %313, %318 : vector<8x128xf32>
    %c16_i32_158 = arith.constant 16 : i32
    %320 = vector.broadcast %c16_i32_158 : i32 to vector<8x128xi32>
    %321 = arith.cmpi sge, %12, %320 : vector<8x128xi32>
    %c16_i32_159 = arith.constant 16 : i32
    %322 = tpu.dynamic_rotate %319 by %c16_i32_159 dim 1 : vector<8x128xf32>, i32 -> vector<8x128xf32>
    %c112_i32_160 = arith.constant 112 : i32
    %323 = tpu.dynamic_rotate %319 by %c112_i32_160 dim 1 : vector<8x128xf32>, i32 -> vector<8x128xf32>
    %324 = arith.select %321, %322, %323 : vector<8x128xi1>, vector<8x128xf32>
    %325 = arith.addf %319, %324 : vector<8x128xf32>
    %c16_161 = arith.constant 16 : index
    %c128_162 = arith.constant 128 : index
    %326 = vector.load %arg9[%c16_161, %c128_162] : memref<24x384xf32, #tpu.memory_space<vmem>>, vector<8x128xf32>
    %327 = arith.mulf %261, %326 : vector<8x128xf32>
    %c1_i32_163 = arith.constant 1 : i32
    %328 = vector.broadcast %c1_i32_163 : i32 to vector<8x128xi32>
    %329 = arith.cmpi sge, %12, %328 : vector<8x128xi32>
    %c1_i32_164 = arith.constant 1 : i32
    %330 = tpu.dynamic_rotate %327 by %c1_i32_164 dim 1 : vector<8x128xf32>, i32 -> vector<8x128xf32>
    %c97_i32_165 = arith.constant 97 : i32
    %331 = tpu.dynamic_rotate %327 by %c97_i32_165 dim 1 : vector<8x128xf32>, i32 -> vector<8x128xf32>
    %332 = arith.select %329, %330, %331 : vector<8x128xi1>, vector<8x128xf32>
    %333 = arith.addf %327, %332 : vector<8x128xf32>
    %c2_i32_166 = arith.constant 2 : i32
    %334 = vector.broadcast %c2_i32_166 : i32 to vector<8x128xi32>
    %335 = arith.cmpi sge, %12, %334 : vector<8x128xi32>
    %c2_i32_167 = arith.constant 2 : i32
    %336 = tpu.dynamic_rotate %333 by %c2_i32_167 dim 1 : vector<8x128xf32>, i32 -> vector<8x128xf32>
    %c98_i32_168 = arith.constant 98 : i32
    %337 = tpu.dynamic_rotate %333 by %c98_i32_168 dim 1 : vector<8x128xf32>, i32 -> vector<8x128xf32>
    %338 = arith.select %335, %336, %337 : vector<8x128xi1>, vector<8x128xf32>
    %339 = arith.addf %333, %338 : vector<8x128xf32>
    %c4_i32_169 = arith.constant 4 : i32
    %340 = vector.broadcast %c4_i32_169 : i32 to vector<8x128xi32>
    %341 = arith.cmpi sge, %12, %340 : vector<8x128xi32>
    %c4_i32_170 = arith.constant 4 : i32
    %342 = tpu.dynamic_rotate %339 by %c4_i32_170 dim 1 : vector<8x128xf32>, i32 -> vector<8x128xf32>
    %c100_i32_171 = arith.constant 100 : i32
    %343 = tpu.dynamic_rotate %339 by %c100_i32_171 dim 1 : vector<8x128xf32>, i32 -> vector<8x128xf32>
    %344 = arith.select %341, %342, %343 : vector<8x128xi1>, vector<8x128xf32>
    %345 = arith.addf %339, %344 : vector<8x128xf32>
    %c8_i32_172 = arith.constant 8 : i32
    %346 = vector.broadcast %c8_i32_172 : i32 to vector<8x128xi32>
    %347 = arith.cmpi sge, %12, %346 : vector<8x128xi32>
    %c8_i32_173 = arith.constant 8 : i32
    %348 = tpu.dynamic_rotate %345 by %c8_i32_173 dim 1 : vector<8x128xf32>, i32 -> vector<8x128xf32>
    %c104_i32_174 = arith.constant 104 : i32
    %349 = tpu.dynamic_rotate %345 by %c104_i32_174 dim 1 : vector<8x128xf32>, i32 -> vector<8x128xf32>
    %350 = arith.select %347, %348, %349 : vector<8x128xi1>, vector<8x128xf32>
    %351 = arith.addf %345, %350 : vector<8x128xf32>
    %c16_i32_175 = arith.constant 16 : i32
    %352 = vector.broadcast %c16_i32_175 : i32 to vector<8x128xi32>
    %353 = arith.cmpi sge, %12, %352 : vector<8x128xi32>
    %c16_i32_176 = arith.constant 16 : i32
    %354 = tpu.dynamic_rotate %351 by %c16_i32_176 dim 1 : vector<8x128xf32>, i32 -> vector<8x128xf32>
    %c112_i32_177 = arith.constant 112 : i32
    %355 = tpu.dynamic_rotate %351 by %c112_i32_177 dim 1 : vector<8x128xf32>, i32 -> vector<8x128xf32>
    %356 = arith.select %353, %354, %355 : vector<8x128xi1>, vector<8x128xf32>
    %357 = arith.addf %351, %356 : vector<8x128xf32>
    %358 = arith.maximumf %293, %325 : vector<8x128xf32>
    %359 = arith.maximumf %358, %357 : vector<8x128xf32>
    %360 = arith.subf %293, %359 : vector<8x128xf32>
    %361 = math.exp %360 : vector<8x128xf32>
    %362 = arith.subf %325, %359 : vector<8x128xf32>
    %363 = math.exp %362 : vector<8x128xf32>
    %364 = arith.subf %357, %359 : vector<8x128xf32>
    %365 = math.exp %364 : vector<8x128xf32>
    %366 = arith.addf %361, %363 : vector<8x128xf32>
    %367 = arith.addf %366, %365 : vector<8x128xf32>
    %368 = tpu.reciprocal %367 : vector<8x128xf32> -> vector<8x128xf32>
    %369 = arith.mulf %361, %368 : vector<8x128xf32>
    %c0_178 = arith.constant 0 : index
    %c256_179 = arith.constant 256 : index
    %370 = vector.load %arg9[%c0_178, %c256_179] : memref<24x384xf32, #tpu.memory_space<vmem>>, vector<8x128xf32>
    %371 = arith.mulf %369, %370 : vector<8x128xf32>
    %372 = arith.mulf %363, %368 : vector<8x128xf32>
    %c8_180 = arith.constant 8 : index
    %c256_181 = arith.constant 256 : index
    %373 = vector.load %arg9[%c8_180, %c256_181] : memref<24x384xf32, #tpu.memory_space<vmem>>, vector<8x128xf32>
    %374 = arith.mulf %372, %373 : vector<8x128xf32>
    %375 = arith.addf %371, %374 : vector<8x128xf32>
    %376 = arith.mulf %365, %368 : vector<8x128xf32>
    %c16_182 = arith.constant 16 : index
    %c256_183 = arith.constant 256 : index
    %377 = vector.load %arg9[%c16_182, %c256_183] : memref<24x384xf32, #tpu.memory_space<vmem>>, vector<8x128xf32>
    %378 = arith.mulf %376, %377 : vector<8x128xf32>
    %379 = arith.addf %375, %378 : vector<8x128xf32>
    %cst_184 = arith.constant dense<0.000000e+00> : vector<8x128xf32>
    %380 = tpu.matmul %379, %13, %cst_184 {dimension_numbers = #tpu.dot_dimension_numbers<[1], [0], [0], [1], [0, 0, 1, 1], [], []>} : vector<8x128xf32>, vector<128x128xf32>, vector<8x128xf32> -> vector<8x128xf32>
    %381 = vector.broadcast %14 : vector<1x128xf32> to vector<8x128xf32>
    %382 = arith.addf %380, %381 : vector<8x128xf32>
    %c0_185 = arith.constant 0 : index
    %c256_186 = arith.constant 256 : index
    %383 = vector.load %arg8[%c0_185, %c256_186] : memref<8x384xf32, #tpu.memory_space<vmem>>, vector<8x128xf32>
    tpu.vector_store %arg8[%c0_185, %c256_186], %382 {strides = array<i32>} : memref<8x384xf32, #tpu.memory_space<vmem>>, vector<8x128xf32>,
    return
  }
  func.func @transform_0(%arg0: i32) -> (i32, i32) {
    %c0_i32 = arith.constant 0 : i32
    %c0_i32_0 = arith.constant 0 : i32
    return %arg0, %c0_i32 : i32, i32
  }
  func.func @transform_1(%arg0: i32) -> (i32, i32) {
    %c0_i32 = arith.constant 0 : i32
    %c0_i32_0 = arith.constant 0 : i32
    return %arg0, %c0_i32 : i32, i32
  }
  func.func @transform_2(%arg0: i32) -> (i32, i32) {
    %c0_i32 = arith.constant 0 : i32
    %c0_i32_0 = arith.constant 0 : i32
    return %arg0, %c0_i32 : i32, i32
  }
  func.func @transform_3(%arg0: i32) -> (i32, i32) {
    %c0_i32 = arith.constant 0 : i32
    %c0_i32_0 = arith.constant 0 : i32
    %c0_i32_1 = arith.constant 0 : i32
    return %c0_i32, %c0_i32_0 : i32, i32
  }
  func.func @transform_4(%arg0: i32) -> (i32, i32) {
    %c0_i32 = arith.constant 0 : i32
    %c0_i32_0 = arith.constant 0 : i32
    %c0_i32_1 = arith.constant 0 : i32
    return %c0_i32, %c0_i32_0 : i32, i32
  }
  func.func @transform_5(%arg0: i32) -> (i32, i32) {
    %c0_i32 = arith.constant 0 : i32
    %c0_i32_0 = arith.constant 0 : i32
    %c0_i32_1 = arith.constant 0 : i32
    return %c0_i32, %c0_i32_0 : i32, i32
  }
  func.func @transform_6(%arg0: i32) -> (i32, i32) {
    %c0_i32 = arith.constant 0 : i32
    %c0_i32_0 = arith.constant 0 : i32
    %c0_i32_1 = arith.constant 0 : i32
    return %c0_i32, %c0_i32_0 : i32, i32
  }
  func.func @transform_7(%arg0: i32) -> (i32, i32) {
    %c0_i32 = arith.constant 0 : i32
    %c0_i32_0 = arith.constant 0 : i32
    return %arg0, %c0_i32 : i32, i32
  }
}

</mosaic_0001>

<bundles_post_ra>
// kernel: tpu_custom_call.1
= control target key start
LH: loop header
LB: loop body
LE: loop exit
PB: predicated region body
PF: predicated region fallthrough
CT: control target
= control target key end

     0   :  { %s2922_s0 = inlined_call_operand.hbm [shape: f32[16,128], index: 0, kind: input, shape index: {}]   ;;  %s2923_s1 = inlined_call_operand.hbm [shape: f32[16,128], index: 1, kind: input, shape index: {}]   ;;  %s2924_s2 = inlined_call_operand.hbm [shape: f32[16,128], index: 2, kind: input, shape index: {}]   ;;  %s2925_s3 = inlined_call_operand.hbm [shape: f32[128,384], index: 3, kind: input, shape index: {}]   ;;  %s2926_s4 = inlined_call_operand.vmem [shape: f32[1,384], index: 4, kind: input, shape index: {}]   ;;  %s2927_s5 = inlined_call_operand.hbm [shape: f32[128,128], index: 5, kind: input, shape index: {}]   ;;  %s2928_s6 = inlined_call_operand.vmem [shape: f32[1,128], index: 6, kind: input, shape index: {}]   ;;  %s2929_s7 = inlined_call_operand.hbm [shape: f32[16,384], index: 7, kind: output, shape index: {}]  }
   0x1   :  { %2947 = sst [smem:[#allocation22_spill]] %s2923_s1 }
   0x2   :  { %2948 = sst [smem:[#allocation23_spill]] %s2925_s3 }
   0x3   :  { %12 = vsyncpa [#allocation4], 0 }
   0x4   :  { %14 = vsyncpa [#allocation4 + $0x1], 0 }
   0x5   :  { %15 = vsyncpa [#allocation7], 0 }
   0x6   :  { %17 = vsyncpa [#allocation7 + $0x1], 0 }
   0x7   :  { %18 = vsyncpa [#allocation10], 0 }
   0x8   :  { %19 = vsyncpa [#allocation5], 0 }
   0x9   :  { %21 = vsyncpa [#allocation5 + $0x1], 0  ;;  %s2161_s24 = smov 0   ;;  %s2163_s25 = smov 0  }
   0xa   :  { %s2165_s26 = smov 0   ;;  %s2167_s27 = smov 0  }
   0xb LB: > { %2949 = sst [smem:[#allocation17_spill]] %s2084_s24  ;;  %s2182_s28 = sadd.s32 4294967295, %s2096_s27   ;;  %s2096_s27 = sphi %s2167_s27, %s2981_s27   ;;  %s2092_s26 = sphi %s2165_s26, %s2985_s26   ;;  %s2088_s25 = sphi %s2163_s25, %s2984_s25   ;;  %s2084_s24 = sphi %s2161_s24, %s2983_s24  }
   0xc   : > { %2950 = sst [smem:[#allocation18_spill]] %s2096_s27  ;;  %s1391_s29 = sadd.s32 4294967294, %s2096_s27  }
   0xd   : > { %p47_p0 = scmp.ne.s32.totalorder %s2088_s25, %s2084_s24  ;;  %p2930_p1 = scmp.eq.s32.totalorder %s2182_s28, 0 }
   0xe   : > { %p213_p3 = scmp.eq.s32.totalorder %s1391_s29, 1  ;;  %p1392_p5 = scmp.ge.s32.totalorder %s2096_s27, 1 }
   0xf   : > { %p2191_p4 = por %p2930_p1, %p47_p0  ;;  %p220_p7 = scmp.lt.s32.totalorder %s2096_s27, 3 }
  0x10   : > { %p2196_p6 = por %p213_p3, %p47_p0  ;;  %s2098_s10 = smov [#allocation9]  }
  0x11   : > { %s2951_s30 = scalar_select %p2191_p4, 1, 0 }
  0x12   : > { %s2952_s8 = scalar_select %p2196_p6, 1, 0 }
  0x13   : > { %p2201_p8 = pnand %p1392_p5, %p220_p7  ;;  %s232_s11 = sshll.u32 %s2098_s10, 4  ;;  %s2205_s11 = int_to_ptr.vmem [resolvable:$true] %s232_s11 }
  0x14   : > { %2953 = sst [smem:[#allocation19_spill]] %s2952_s8  ;;  %s2217_s13 = sadd.s32 1, %s2096_s27  }
  0x15   : > { %s2954_s9 = scalar_select %p2201_p8, 1, 0 }
  0x16   : > { %p1774_p9 = pneg %p2201_p8  ;;  %2956 = sst [smem:[#allocation20_spill]] %s2217_s13 }
  0x17   : > { %s34_s14 = sadd.s32 1, %s2092_s26  ;;  %s31_s15 = ssub.s32 %s2096_s27, %s2217_s13 }
  0x18   : > { %p2212_p11 = pnand %p1774_p9, %p2930_p1  ;;  %s2957_s3 = sld [smem:[#allocation23_spill]] }
  0x1a   : > { %s2955_s12 = scalar_select %p2212_p11, 1, 0 }
  0x1b   : > { %p2934_p13 = pneg %p2212_p11 }
  0x1e   : > { %s1876_s18 = scalar_lea.hbm %s2957_s3, 6144 }
  0x1f   : > { %p1877_p12 = scmp.ne.s32.totalorder %s2957_s3, %s1876_s18  ;;  %p1883_p5 = scmp.lt.u32.totalorder %s1876_s18, %s2957_s3 }
  0x21   : > { %p1879_p0 = pnand %p2934_p13, %p1877_p12 }
  0x23   : > { %p1880_p3 = pneg %p1879_p0 }
  0x25   : > { %p1885_p7 = pnand %p1883_p5, %p1880_p3 }
  0x27   : > { %1888 = shalt.err (!%p1885_p7)
}
  0x28   : > { %s1889_s23 = scalar_lea.vmem %s2205_s11, 6144  ;;  %p1897_p2 = scmp.lt.s32.totalorder %s2205_s11, %s2205_s11 }
  0x29   : > { %p1890_p9 = scmp.ne.s32.totalorder %s2205_s11, %s1889_s23  ;;  %p1898_p12 = scmp.lt.s32.totalorder %s1889_s23, %s1889_s23 }
  0x2b   : > { %p1892_p10 = pnand %p1890_p9, %p2934_p13  ;;  %p1899_p0 = por %p1898_p12, %p1897_p2 }
  0x2d   : > { %p1893_p1 = pneg %p1892_p10 }
  0x2f   : > { %p1900_p6 = pnand %p1899_p0, %p1893_p1 }
  0x31   : > { %1903 = shalt.err (!%p1900_p6)
}
  0x32   : > { %s2099_s29 = smov 384   ;;  %s2100_s10 = smov 24  }
  0x33   : > { %1777 = dma.hbm_to_vmem [thread:$0]  (!%p2212_p11), %s2957_s3, 6144, %s2205_s11, [#allocation10], %s2099_s29, %s2099_s29, %s2100_s10  }
  0x34   : > { %p32_p1 = scmp.eq.s32.totalorder %s31_s15, 0  ;;  %p41_p2 = scmp.ne.s32.totalorder %s2092_s26, %s2088_s25 }
  0x35   : > { %p42_p6 = scmp.eq.s32.totalorder %s2096_s27, 0  ;;  %p1797_p10 = scmp.lt.s32.totalorder %s2096_s27, 2 }
  0x36   : > { %s2254_s18 = scalar_select %p32_p1, %s2092_s26, %s34_s14  }
  0x37   : > { %p43_p3 = por %p42_p6, %p41_p2  ;;  %p2959_p5 = scmp.eq.s32.totalorder %s2182_s28, 1 }
  0x38   : > { %2958 = sst [smem:[#allocation21_spill]] %s2254_s18  ;;  %s2931_s20 = sand.u32 1, %s2092_s26  }
  0x39   : > { %p2258_p7 = por %p2959_p5, %p41_p2  ;;  %s2264_s21 = sshll.u32 %s2096_s27, 7 }
  0x3a   : > { %s2268_s22 = sshll.u32 %s2931_s20, 3  ;;  %p2270_p9 = pnand %p1797_p10, %p43_p3 }
  0x3b   : > { %s2960_s19 = scalar_select %p2258_p7, 1, 0 }
  0x3c   : > { %s2961_s11 = scalar_select %p2270_p9, 1, 0 }
  0x3d   : > { %s283_s14 = sand.u32 1, %s2096_s27   ;;  %s2962_s1 = sld [smem:[#allocation22_spill]] }
  0x3e   : > { %s287_s10 = scalar_lea.vmem [#allocation6], %s2268_s22  ;;  %s2284_s17 = scalar_lea.sflag [#allocation7], %s283_s14 }
  0x3f   : > { %s294_s16 = sshll.u32 %s287_s10, 4  ;;  %p2290_p0 = pneg %p2270_p9  ;;  %s2282_s16 = int_to_ptr.vmem [resolvable:$true] %s294_s16 }
  0x41   : > { %s2963_s3 = scalar_select %p2290_p0, 1, 0 }
  0x43   : > { %s2279_s29 = scalar_lea.hbm %s2962_s1, %s2264_s21  ;;  %s1909_s18 = scalar_lea.hbm %s2962_s1, 256 }
  0x44   : > { %s1904_s20 = scalar_lea.hbm %s2279_s29, 128  ;;  %p1910_p6 = scmp.lt.u32.totalorder %s2279_s29, %s2962_s1 }
  0x45   : > { %p1905_p12 = scmp.ne.s32.totalorder %s2279_s29, %s1904_s20  ;;  %p1911_p10 = scmp.lt.u32.totalorder %s1909_s18, %s1904_s20 }
  0x46   : > { %p1913_p5 = scmp.lt.u32.totalorder %s1904_s20, %s2279_s29 }
  0x47   : > { %p1907_p1 = pnand %p2290_p0, %p1905_p12  ;;  %p1912_p3 = por %p1911_p10, %p1910_p6 }
  0x49   : > { %p1908_p2 = pneg %p1907_p1  ;;  %p1914_p13 = por %p1913_p5, %p1912_p3 }
  0x4b   : > { %p1915_p7 = pnand %p1914_p13, %p1908_p2 }
  0x4d   : > { %1918 = shalt.err (!%p1915_p7)
}
  0x4e   : > { %s1919_s14 = scalar_lea.vmem %s2282_s16, 128  ;;  %s2101_s15 = smov [#allocation6]  }
  0x4f   : > { %p1920_p12 = scmp.ne.s32.totalorder %s2282_s16, %s1919_s14  ;;  %s1924_s23 = sshll.u32 %s2101_s15, 4  ;;  %s1925_s23 = int_to_ptr.vmem [resolvable:$false] %s1924_s23 }
  0x50   : > { %s1926_s13 = scalar_lea.vmem %s1925_s23, 256  ;;  %p1927_p8 = scmp.lt.s32.totalorder %s2282_s16, %s1925_s23 }
  0x51   : > { %p1922_p1 = pnand %p1920_p12, %p2290_p0  ;;  %p1928_p11 = scmp.lt.s32.totalorder %s1926_s13, %s1919_s14 }
  0x53   : > { %p1923_p4 = pneg %p1922_p1  ;;  %p1929_p6 = por %p1928_p11, %p1927_p8 }
  0x55   : > { %p1930_p10 = pnand %p1929_p6, %p1923_p4 }
  0x57   : > { %1933 = shalt.err (!%p1930_p10)
}
  0x58   : > { %1787 = dma.hbm_to_vmem [thread:$0]  (!%p2270_p9), %s2279_s29, 128, %s2282_s16, %s2284_s17  }
  0x59   : > { %s2102_s18 = smov [#allocation11]   ;;  %s1934_s15 = scalar_lea.hbm %s2927_s5, 2048 }
  0x5a   : > { %s248_s20 = sshll.u32 %s2102_s18, 4  ;;  %p1935_p8 = scmp.ne.s32.totalorder %s2927_s5, %s1934_s15  ;;  %s249_s20 = int_to_ptr.vmem [resolvable:$true] %s248_s20 }
  0x5b   : > { %p2964_p4 = scmp.ne.s32.totalorder %s2955_s12, 0  ;;  %p1941_p2 = scmp.lt.u32.totalorder %s1934_s15, %s2927_s5 }
  0x5d   : > { %p2965_p11 = pneg %p2964_p4 }
  0x5f   : > { %p1937_p13 = pnand %p1935_p8, %p2965_p11 }
  0x61   : > { %p1938_p7 = pneg %p1937_p13 }
  0x63   : > { %p1943_p3 = pnand %p1941_p2, %p1938_p7 }
  0x65   : > { %1946 = shalt.err (!%p1943_p3)
}
  0x66   : > { %s1947_s29 = scalar_lea.vmem %s249_s20, 2048  ;;  %p2966_p12 = pmov %p2965_p11 }
  0x67   : > { %p1948_p5 = scmp.ne.s32.totalorder %s249_s20, %s1947_s29  ;;  %p1955_p10 = scmp.lt.s32.totalorder %s249_s20, %s249_s20 }
  0x68   : > { %p1956_p9 = scmp.lt.s32.totalorder %s1947_s29, %s1947_s29 }
  0x69   : > { %p1950_p1 = pnand %p1948_p5, %p2966_p12 }
  0x6a   : > { %p1957_p0 = por %p1956_p9, %p1955_p10 }
  0x6b   : > { %p1951_p6 = pneg %p1950_p1 }
  0x6d   : > { %p1958_p8 = pnand %p1957_p0, %p1951_p6 }
  0x6f   : > { %1961 = shalt.err (!%p1958_p8)
}
  0x70   : > { %s2103_s1 = smov 128   ;;  %s2104_s27 = smov 8  }
  0x71   : > { %1780 = dma.hbm_to_vmem [thread:$0]  (!%p2964_p4), %s2927_s5, 2048, %s249_s20, [#allocation10], %s2103_s1, %s2103_s1, %s2104_s27  }
  0x72   : > { %s2338_s23 = scalar_lea.hbm %s2922_s0, %s2264_s21  ;;  %s269_s14 = scalar_lea.vmem [#allocation3], %s2268_s22 }
  0x73   : > { %s276_s13 = sshll.u32 %s269_s14, 4  ;;  %s2967_s29 = sand.u32 1, %s2092_s26   ;;  %s277_s13 = int_to_ptr.vmem [resolvable:$true] %s276_s13 }
  0x74   : > { %s266_s8 = scalar_lea.sflag [#allocation4], %s2967_s29  ;;  %s1962_s24 = scalar_lea.hbm %s2338_s23, 128 }
  0x75   : > { %p1963_p9 = scmp.ne.s32.totalorder %s2338_s23, %s1962_s24  ;;  %p2968_p0 = scmp.ne.s32.totalorder %s2963_s3, 0 }
  0x76   : > { %s1967_s1 = scalar_lea.hbm %s2922_s0, 256  ;;  %p1968_p4 = scmp.lt.u32.totalorder %s2338_s23, %s2922_s0 }
  0x77   : > { %p1965_p11 = pnand %p1963_p9, %p2968_p0  ;;  %p1969_p7 = scmp.lt.u32.totalorder %s1967_s1, %s1962_s24 }
  0x78   : > { %p1971_p3 = scmp.lt.u32.totalorder %s1962_s24, %s2338_s23 }
  0x79   : > { %p1966_p13 = pneg %p1965_p11  ;;  %p1970_p2 = por %p1969_p7, %p1968_p4 }
  0x7b   : > { %p1972_p5 = por %p1971_p3, %p1970_p2 }
  0x7d   : > { %p1973_p12 = pnand %p1972_p5, %p1966_p13 }
  0x7f   : > { %1976 = shalt.err (!%p1973_p12)
}
  0x80   : > { %s1977_s18 = scalar_lea.vmem %s277_s13, 128  ;;  %s2105_s10 = smov [#allocation3]  }
  0x81   : > { %p1978_p1 = scmp.ne.s32.totalorder %s277_s13, %s1977_s18  ;;  %s1982_s15 = sshll.u32 %s2105_s10, 4  ;;  %s1983_s15 = int_to_ptr.vmem [resolvable:$false] %s1982_s15 }
  0x82   : > { %s1984_s14 = scalar_lea.vmem %s1983_s15, 256  ;;  %p1985_p8 = scmp.lt.s32.totalorder %s277_s13, %s1983_s15 }
  0x83   : > { %p1980_p6 = pnand %p1978_p1, %p2968_p0  ;;  %p1986_p9 = scmp.lt.s32.totalorder %s1984_s14, %s1977_s18 }
  0x85   : > { %p1981_p10 = pneg %p1980_p6  ;;  %p1987_p11 = por %p1986_p9, %p1985_p8 }
  0x87   : > { %p1988_p4 = pnand %p1987_p11, %p1981_p10 }
  0x89   : > { %1991 = shalt.err (!%p1988_p4)
}
  0x8a   : > { %p2969_p7 = scmp.ne.s32.totalorder %s2961_s11, 0  ;;  %s2364_s12 = scalar_lea.hbm %s2924_s2, %s2264_s21 }
  0x8b   : > { %s305_s20 = scalar_lea.vmem [#allocation8], %s2268_s22  ;;  %s1992_s27 = scalar_lea.hbm %s2364_s12, 128 }
  0x8c   : > { %1784 = dma.hbm_to_vmem [thread:$0]  (!%p2969_p7), %s2338_s23, 128, %s277_s13, %s266_s8  }
  0x8d   : > { %s312_s1 = sshll.u32 %s305_s20, 4  ;;  %p1993_p13 = scmp.ne.s32.totalorder %s2364_s12, %s1992_s27  ;;  %s313_s1 = int_to_ptr.vmem [resolvable:$true] %s312_s1 }
  0x8e   : > { %s1997_s8 = scalar_lea.hbm %s2924_s2, 256  ;;  %p1998_p5 = scmp.lt.u32.totalorder %s2364_s12, %s2924_s2 }
  0x8f   : > { %p1995_p2 = pnand %p1993_p13, %p2968_p0  ;;  %p1999_p12 = scmp.lt.u32.totalorder %s1997_s8, %s1992_s27 }
  0x90   : > { %p2001_p6 = scmp.lt.u32.totalorder %s1992_s27, %s2364_s12 }
  0x91   : > { %p1996_p3 = pneg %p1995_p2  ;;  %p2000_p1 = por %p1999_p12, %p1998_p5 }
  0x93   : > { %p2002_p10 = por %p2001_p6, %p2000_p1 }
  0x95   : > { %p2003_p8 = pnand %p2002_p10, %p1996_p3 }
  0x97   : > { %2006 = shalt.err (!%p2003_p8)
}
  0x98   : > { %s2007_s21 = scalar_lea.vmem %s313_s1, 128  ;;  %s2106_s22 = smov [#allocation8]  }
  0x99   : > { %p2008_p9 = scmp.ne.s32.totalorder %s313_s1, %s2007_s21  ;;  %s2012_s10 = sshll.u32 %s2106_s22, 4  ;;  %s2013_s10 = int_to_ptr.vmem [resolvable:$false] %s2012_s10 }
  0x9a   : > { %s2014_s15 = scalar_lea.vmem %s2013_s10, 256  ;;  %p2015_p13 = scmp.lt.s32.totalorder %s313_s1, %s2013_s10 }
  0x9b   : > { %p2010_p11 = pnand %p2008_p9, %p2968_p0  ;;  %p2016_p2 = scmp.lt.s32.totalorder %s2014_s15, %s2007_s21 }
  0x9d   : > { %p2011_p4 = pneg %p2010_p11  ;;  %p2017_p7 = por %p2016_p2, %p2015_p13 }
  0x9f   : > { %p2018_p5 = pnand %p2017_p7, %p2011_p4 }
  0xa1   : > { %2021 = shalt.err (!%p2018_p5)
}
  0xa2   : > { %p2970_p12 = scmp.ne.s32.totalorder %s2961_s11, 0  ;;  %p2971_p3 = scmp.ne.s32.totalorder %s2954_s9, 0 }
  0xa3   : > { %s2388_s3 = sand.u32 (!%p2971_p3), 1, %s2088_s25   ;;  %p2972_p0 = scmp.ne.s32.totalorder (!%p2971_p3), %s2951_s30, 0 }
  0xa4   : > { %1790 = dma.hbm_to_vmem [thread:$0]  (!%p2970_p12), %s2364_s12, 128, %s313_s1, %s2284_s17  }
  0xa5   : > { %321 = sbr.rel (%p2971_p3) target bundleno = 1334 (0x536), region = 48  ;;  %s2391_s14 = sshll.u32 (!%p2971_p3), %s2388_s3, 3 }
  0xa6   : > { %s324_s24 = scalar_lea.sflag (!%p2971_p3), [#allocation4], %s2388_s3  ;;  %s327_s29 = scalar_lea.vmem (!%p2971_p3), [#allocation3], %s2391_s14 }
  0xac   : > { %2067 = dma.done.wait (%p2972_p0), %s324_s24, 128  }
  0xad   : > { %2069 = vsyncadd (%p2972_p0), %s324_s24, 4294967168  ;;  %s332_s9 = sand.u32 1, %s2182_s28   ;;  %s336_s17 = scalar_lea.vmem [#allocation6], %s2391_s14 }
  0xae   : > { %s333_s11 = scalar_lea.sflag [#allocation7], %s332_s9 }
  0xaf   : > { %2071 = dma.done.wait (%p2972_p0), %s333_s11, 256  }
  0xb0   : > { %2073 = vsyncadd (%p2972_p0), %s333_s11, 4294967040  ;;  %s345_s12 = scalar_lea.vmem [#allocation8], %s2391_s14  ;;  %p2973_p7 = scmp.eq.s32.totalorder %s2182_s28, 0 }
  0xb2   : > { %2075 = dma.done.wait (%p2973_p7), [#allocation10], 8192   ;;  %p2974_p1 = pmov %p2973_p7 }
  0xb3   : > { %v2107_v0 = vmov 0.0   ;;  %v398_v1 = vld [vmem:[#allocation9 + $0x8] sm:$0xff]  ;;  %v401_v2 = vld [vmem:[#allocation9 + $0x20] sm:$0xff]  ;;  %v400_v5 = vld [vmem:[#allocation9 + $0x18] sm:$0xff]  ;;  %v447_v52 = vlaneseq  ;;  %s2108_s1 = smov 1   ;;  %s2109_s27 = smov 97  }
  0xb4   : > { %2077 = vsyncadd (%p2974_p1), [#allocation10], 4294959104  ;;  %526 = vmatprep.mubr.f32.mxu0 %v2107_v0  ;;  %v397_v3 = vld [vmem:[#allocation9] sm:$0xff]  ;;  %v1628_v4 = vpack.c.bf16 %v401_v2, %v398_v1  ;;  %v404_v6 = vld [vmem:[#allocation9 + $0x38] sm:$0xff]  ;;  %s2110_s16 = smov 98   ;;  %s2111_s18 = smov 2  }
  0xb5   : > { %v407_v7 = vld [vmem:[#allocation9 + $0x50] sm:$0xff]  ;;  %v1630_v8 = vpack.c.bf16 %v400_v5, %v397_v3  ;;  %v406_v11 = vld [vmem:[#allocation9 + $0x48] sm:$0xff]  ;;  %v413_v13 = vld [vmem:[#allocation9 + $0x80] sm:$0xff]  ;;  %v2428_v53 = vshrl.u32 %v447_v52, 7  ;;  %s2112_s8 = smov 100   ;;  %s2113_s23 = smov 4  }
  0xb6   : > { %v1632_v9 = vpack.c.bf16 %v407_v7, %v404_v6  ;;  %v403_v10 = vld [vmem:[#allocation9 + $0x30] sm:$0xff]  ;;  %v410_v12 = vld [vmem:[#allocation9 + $0x68] sm:$0xff]  ;;  %1629 = vmatprep.subr.bf16.mxu0 %v1628_v4  ;;  %v409_v16 = vld [vmem:[#allocation9 + $0x60] sm:$0xff]  ;;  %vm2115_vm2 = vmmov 0   ;;  %s2116_s13 = smov 104   ;;  %s2117_s21 = smov 8  }
  0xb7   : > { %1631 = vmatpush1.bf16.msra.mxu0 %v1630_v8  ;;  %v1634_v14 = vpack.c.bf16 %v406_v11, %v403_v10  ;;  %v1636_v15 = vpack.c.bf16 %v413_v13, %v410_v12  ;;  %v412_v17 = vld [vmem:[#allocation9 + $0x78] sm:$0xff]  ;;  %v419_v19 = vld [vmem:[#allocation9 + $0xb0] sm:$0xff]  ;;  %v418_v23 = vld [vmem:[#allocation9 + $0xa8] sm:$0xff]  ;;  %v449_v54 = vsub.s32 0, %v2428_v53  ;;  %v453_v56 = vsub.s32 1, %v2428_v53  ;;  %1514 = vmatprep.mubr.msk.f32.mxu1 %vm2115_vm2, %v2107_v0  ;;  %s2118_s22 = smov 112  }
  0xb8   : > { %1633 = vmatprep.subr.bf16.mxu0 %v1632_v9  ;;  %v416_v18 = vld [vmem:[#allocation9 + $0x98] sm:$0xff]  ;;  %v1638_v20 = vpack.c.bf16 %v412_v17, %v409_v16  ;;  %v415_v22 = vld [vmem:[#allocation9 + $0x90] sm:$0xff]  ;;  %v422_v24 = vld [vmem:[#allocation9 + $0xc8] sm:$0xff]  ;;  %v635_v17 = vand.u32 127, %v447_v52  ;;  %s2119_s10 = smov 16   ;;  %s1756_s15 = smul.u32 24, %s2388_s3 }
  0xb9   : > { %v1640_v21 = vpack.c.bf16 %v419_v19, %v416_v18  ;;  %v425_v25 = vld [vmem:[#allocation9 + $0xe0] sm:$0xff]  ;;  %v1642_v26 = vpack.c.bf16 %v418_v23, %v415_v22  ;;  %v424_v29 = vld [vmem:[#allocation9 + $0xd8] sm:$0xff]  ;;  %v431_v31 = vld [vmem:[#allocation9 + $0x110] sm:$0xff]  ;;  %s1757_s9 = smul.u32 384, %s2182_s28  ;;  %s1245_s20 = scalar_lea.sflag [#allocation5], %s2388_s3 }
  0xba   : > { %v1644_v27 = vpack.c.bf16 %v425_v25, %v422_v24  ;;  %v421_v28 = vld [vmem:[#allocation9 + $0xc0] sm:$0xff]  ;;  %v428_v30 = vld [vmem:[#allocation9 + $0xf8] sm:$0xff]  ;;  %v427_v34 = vld [vmem:[#allocation9 + $0xf0] sm:$0xff]  ;;  %v2460_v18 = vand.u32 31, %v635_v17  ;;  %p2975_p10 = scmp.ne.s32.totalorder %s2960_s19, 0  ;;  %s2120_s28 = smov [#allocation12]  }
  0xbb   : > { %1635 = vmatpush1.bf16.msra.mxu0 %v1634_v14  ;;  %v1646_v32 = vpack.c.bf16 %v424_v29, %v421_v28  ;;  %v1648_v33 = vpack.c.bf16 %v431_v31, %v428_v30  ;;  %v430_v35 = vld [vmem:[#allocation9 + $0x108] sm:$0xff]  ;;  %v437_v37 = vld [vmem:[#allocation9 + $0x140] sm:$0xff]  ;;  %v436_v41 = vld [vmem:[#allocation9 + $0x138] sm:$0xff]  ;;  %s2878_s30 = scalar_lea.hbm %s2929_s7, %s1757_s9 }
  0xbc   : > { %1637 = vmatprep.subr.bf16.mxu0 %v1636_v15  ;;  %v434_v36 = vld [vmem:[#allocation9 + $0x128] sm:$0xff]  ;;  %v1650_v38 = vpack.c.bf16 %v430_v35, %v427_v34  ;;  %v433_v40 = vld [vmem:[#allocation9 + $0x120] sm:$0xff]  ;;  %v440_v42 = vld [vmem:[#allocation9 + $0x158] sm:$0xff]  ;;  %vm657_vm0 = vcmp.ge.s32.totalorder %v2460_v18, 1  ;;  %vm664_vm1 = vcmp.ge.s32.totalorder %v2460_v18, 2  ;;  %vm671_vm3 = vcmp.ge.s32.totalorder %v2460_v18, 4 }
  0xbd   : > { %v1652_v39 = vpack.c.bf16 %v437_v37, %v434_v36  ;;  %v443_v43 = vld [vmem:[#allocation9 + $0x170] sm:$0xff]  ;;  %v1654_v44 = vpack.c.bf16 %v436_v41, %v433_v40  ;;  %v442_v47 = vld [vmem:[#allocation9 + $0x168] sm:$0xff]  ;;  %vm678_vm4 = vcmp.ge.s32.totalorder %v2460_v18, 8  ;;  %vm685_vm5 = vcmp.ge.s32.totalorder %v2460_v18, 16 }
  0xbe   : > { %v1656_v45 = vpack.c.bf16 %v443_v43, %v440_v42  ;;  %v439_v46 = vld [vmem:[#allocation9 + $0x150] sm:$0xff]  ;;  %v2419_v50 = vld [vmem:[%s336_s17] sm:$0xff] }
  0xbf   : > { %1639 = vmatpush1.bf16.msra.mxu0 %v1638_v20  ;;  %v1658_v48 = vpack.c.bf16 %v442_v47, %v439_v46  ;;  %v2413_v49 = vld [vmem:[%s327_s29] sm:$0xff]  ;;  %s393_s29 = scalar_lea.vmem [#allocation12], %s1756_s15 }
  0xc0   : > { %1641 = vmatprep.subr.bf16.mxu0 %v1640_v21  ;;  %v2425_v51 = vld [vmem:[%s345_s12] sm:$0xff]  ;;  %s1259_s11 = sshll.u32 %s393_s29, 4  ;;  %s2880_s11 = int_to_ptr.vmem [resolvable:$true] %s1259_s11 }
  0xc1   : > { %v2434_v55 = vld [vmem:[%s2926_s4] sm:$0x7] }
  0xc2   : > { %v450_v57 = vrot.slane %v2434_v55, %v449_v54  ;;  %v454_v58 = vrot.slane %v2434_v55, %v453_v56 }
  0xc3   : > { %1643 = vmatpush1.bf16.msra.mxu0 %v1642_v26 }
  0xc4   : > { %1645 = vmatprep.subr.bf16.mxu0 %v1644_v27 }
  0xc7   : > { %1647 = vmatpush1.bf16.msra.mxu0 %v1646_v32 }
  0xc8   : > { %1649 = vmatprep.subr.bf16.mxu0 %v1648_v33 }
  0xcb   : > { %1651 = vmatpush1.bf16.msra.mxu0 %v1650_v38 }
  0xcc   : > { %1653 = vmatprep.subr.bf16.mxu0 %v1652_v39 }
  0xcf   : > { %1655 = vmatpush1.bf16.msra.mxu0 %v1654_v44 }
  0xd0   : > { %1657 = vmatprep.subr.bf16.mxu0 %v1656_v45 }
  0xd3   : > { %1659 = vmatpush1.bf16.msra.mxu0 %v1658_v48 }
  0xd6   : > { %527 = vmatmul.mubr.f32.vlgmr.msra.gmra.mrb[0].mxu0 %v2413_v49 }
  0xd7   : > { %532 = vmatprep.mubr.f32.mxu0 %v2107_v0 }
  0xda   : > { %533 = vmatmul.mubr.f32.gmra.mrb[2].mxu0 %v2419_v50 }
  0xdb   : > { %538 = vmatprep.mubr.f32.mxu0 %v2107_v0 }
  0xde   : > { %539 = vmatmul.mubr.f32.gmra.mrb[4].mxu0 %v2425_v51 }
  0xdf   : > { %1555 = vmatprep.mubr.msk.f32.mxu0 %vm2115_vm2, %v2107_v0 }
 0x1a9   : > { %v528_v59 = vpop.f32.mrb[0].mxu0 }
 0x1aa   : > { %v529_v60 = vadd.f32 %v528_v59, %v450_v57  ;;  %v530_v61 = vpop.f32.mrb[1].mxu0 }
 0x1ab   : > { %v531_v62 = vadd.f32 %v530_v61, %v454_v58 }
 0x1ad   : > { %v534_v63 = vpop.f32.mrb[2].mxu0  ;;  %v656_v1 = vmul.f32 %v531_v62, %v529_v60 }
 0x1ae   : > { %v535_v2 = vadd.f32 %v534_v63, %v450_v57  ;;  %v536_v3 = vpop.f32.mrb[3].mxu0 }
 0x1af   : > { %v537_v4 = vadd.f32 %v536_v3, %v454_v58  ;;  %658 = vrot.lane.b32.xlu0 %v656_v1, %s2108_s1 }
 0x1b0   : > { %v860_v5 = vmul.f32 %v535_v2, %v531_v62 }
 0x1b1   : > { %v540_v6 = vpop.f32.mrb[4].mxu0  ;;  %v693_v7 = vmul.f32 %v537_v4, %v529_v60  ;;  %v892_v8 = vmul.f32 %v537_v4, %v535_v2 }
 0x1b2   : > { %v541_v9 = vadd.f32 %v540_v6, %v450_v57  ;;  %v542_v10 = vpop.f32.mrb[5].mxu0 }
 0x1b3   : > { %v543_v11 = vadd.f32 %v542_v10, %v454_v58  ;;  %694 = vrot.lane.b32.xlu1 %v693_v7, %s2108_s1  ;;  %660 = vrot.lane.b32.xlu0 %v656_v1, %s2109_s27 }
 0x1b4   : > { %v1053_v12 = vmul.f32 %v541_v9, %v531_v62  ;;  %v2441_v13 = vmul.f32 %v541_v9, %v537_v4 }
 0x1b5   : > { %v725_v14 = vmul.f32 %v543_v11, %v529_v60  ;;  %v2443_v15 = vmul.f32 %v543_v11, %v535_v2  ;;  %v2445_v16 = vmul.f32 %v543_v11, %v541_v9 }
 0x1b7   : > { %696 = vrot.lane.b32.xlu1 %v693_v7, %s2109_s27  ;;  %726 = vrot.lane.b32.xlu0 %v725_v14, %s2108_s1 }
 0x1bb   : > { %728 = vrot.lane.b32.xlu1 %v725_v14, %s2109_s27  ;;  %861 = vrot.lane.b32.xlu0 %v860_v5, %s2108_s1 }
 0x1bf   : > { %863 = vrot.lane.b32.xlu1 %v860_v5, %s2109_s27  ;;  %893 = vrot.lane.b32.xlu0 %v892_v8, %s2108_s1 }
 0x1c3   : > { %895 = vrot.lane.b32.xlu1 %v892_v8, %s2109_s27  ;;  %1054 = vrot.lane.b32.xlu0 %v1053_v12, %s2108_s1 }
 0x1c7   : > { %1056 = vrot.lane.b32.xlu1 %v1053_v12, %s2109_s27  ;;  %1086 = vrot.lane.b32.xlu0 %v2441_v13, %s2108_s1 }
 0x1cb   : > { %1088 = vrot.lane.b32.xlu1 %v2441_v13, %s2109_s27  ;;  %925 = vrot.lane.b32.xlu0 %v2443_v15, %s2108_s1 }
 0x1cf   : > { %927 = vrot.lane.b32.xlu1 %v2443_v15, %s2109_s27  ;;  %1118 = vrot.lane.b32.xlu0 %v2445_v16, %s2108_s1  ;;  %s2022_s1 = scalar_lea.vmem %s2880_s11, 384 }
 0x1d0   : > { %p2023_p6 = scmp.ne.s32.totalorder %s2880_s11, %s2022_s1 }
 0x1d2   : > { %p2024_p8 = pnand %p2023_p6, %p2975_p10 }
 0x1d3   : > { %1120 = vrot.lane.b32.xlu1 %v2445_v16, %s2109_s27  ;;  %s2026_s27 = sshll.u32 %s2120_s28, 4  ;;  %s2027_s27 = int_to_ptr.vmem [resolvable:$false] %s2026_s27 }
 0x1d4   : > { %p2025_p9 = pneg %p2024_p8  ;;  %p2029_p11 = scmp.lt.s32.totalorder %s2880_s11, %s2027_s27 }
 0x221   : > { %v659_v19 = vpop.permute.xlu0 %658 }
 0x225   : > { %v695_v20 = vpop.permute.xlu1 %694  ;;  %v661_v21 = vpop.permute.xlu0 %660 }
 0x226   : > { %v662_v22 = vsel %vm657_vm0, %v659_v19, %v661_v21  ;;  %v2114_v19 = vmov 0.0|0.0  }
 0x227   : > { %v663_v23 = vadd.f32 %v662_v22, %v656_v1  ;;  %1660 = vmatprep.subr.bf16.mxu1 %v2114_v19  ;;  %1684 = vmatprep.subr.bf16.mxu0 %v2114_v19 }
 0x229   : > { %v697_v24 = vpop.permute.xlu1 %696  ;;  %667 = vrot.lane.b32.xlu1 %v663_v23, %s2110_s16  ;;  %665 = vrot.lane.b32.xlu0 %v663_v23, %s2111_s18  ;;  %v727_v25 = vpop.permute.xlu0 %726 }
 0x22a   : > { %v698_v26 = vsel %vm657_vm0, %v695_v20, %v697_v24  ;;  %v405_v24 = vld [vmem:[#allocation9 + $0x40] sm:$0xff] }
 0x22b   : > { %v699_v27 = vadd.f32 %v698_v26, %v693_v7 }
 0x22d   : > { %v729_v28 = vpop.permute.xlu1 %728  ;;  %702 = vrot.lane.b32.xlu1 %v699_v27, %s2110_s16  ;;  %700 = vrot.lane.b32.xlu0 %v699_v27, %s2111_s18  ;;  %v862_v29 = vpop.permute.xlu0 %861 }
 0x22e   : > { %v730_v30 = vsel %vm657_vm0, %v727_v25, %v729_v28  ;;  %v408_v25 = vld [vmem:[#allocation9 + $0x58] sm:$0xff] }
 0x22f   : > { %v731_v31 = vadd.f32 %v730_v30, %v725_v14 }
 0x231   : > { %v864_v32 = vpop.permute.xlu1 %863  ;;  %734 = vrot.lane.b32.xlu1 %v731_v31, %s2110_s16  ;;  %732 = vrot.lane.b32.xlu0 %v731_v31, %s2111_s18  ;;  %v894_v33 = vpop.permute.xlu0 %893 }
 0x232   : > { %v865_v34 = vsel %vm657_vm0, %v862_v29, %v864_v32  ;;  %v414_v32 = vld [vmem:[#allocation9 + $0x88] sm:$0xff] }
 0x233   : > { %v866_v35 = vadd.f32 %v865_v34, %v860_v5 }
 0x235   : > { %v896_v36 = vpop.permute.xlu1 %895  ;;  %869 = vrot.lane.b32.xlu1 %v866_v35, %s2110_s16  ;;  %867 = vrot.lane.b32.xlu0 %v866_v35, %s2111_s18  ;;  %v1055_v37 = vpop.permute.xlu0 %1054 }
 0x236   : > { %v897_v38 = vsel %vm657_vm0, %v894_v33, %v896_v36  ;;  %v417_v36 = vld [vmem:[#allocation9 + $0xa0] sm:$0xff] }
 0x237   : > { %v898_v39 = vadd.f32 %v897_v38, %v892_v8 }
 0x239   : > { %v1057_v40 = vpop.permute.xlu1 %1056  ;;  %901 = vrot.lane.b32.xlu1 %v898_v39, %s2110_s16  ;;  %899 = vrot.lane.b32.xlu0 %v898_v39, %s2111_s18  ;;  %v1087_v41 = vpop.permute.xlu0 %1086 }
 0x23a   : > { %v1058_v42 = vsel %vm657_vm0, %v1055_v37, %v1057_v40  ;;  %v420_v37 = vld [vmem:[#allocation9 + $0xb8] sm:$0xff] }
 0x23b   : > { %v2485_v43 = vadd.f32 %v1058_v42, %v1053_v12  ;;  %v1670_v38 = vpack.c.bf16 %v420_v37, %v417_v36  ;;  %v426_v42 = vld [vmem:[#allocation9 + $0xe8] sm:$0xff] }
 0x23d   : > { %v1089_v44 = vpop.permute.xlu1 %1088  ;;  %1062 = vrot.lane.b32.xlu1 %v2485_v43, %s2110_s16  ;;  %1060 = vrot.lane.b32.xlu0 %v2485_v43, %s2111_s18  ;;  %v926_v47 = vpop.permute.xlu0 %925 }
 0x23e   : > { %v1090_v45 = vsel %vm657_vm0, %v1087_v41, %v1089_v44  ;;  %v423_v41 = vld [vmem:[#allocation9 + $0xd0] sm:$0xff] }
 0x23f   : > { %v2494_v46 = vadd.f32 %v1090_v45, %v2441_v13  ;;  %v1673_v45 = vpack.c.bf16 %v426_v42, %v423_v41 }
 0x241   : > { %v928_v48 = vpop.permute.xlu1 %927  ;;  %1094 = vrot.lane.b32.xlu1 %v2494_v46, %s2110_s16  ;;  %1092 = vrot.lane.b32.xlu0 %v2494_v46, %s2111_s18  ;;  %v1119_v56 = vpop.permute.xlu0 %1118 }
 0x242   : > { %v929_v52 = vsel %vm657_vm0, %v926_v47, %v928_v48  ;;  %v429_v48 = vld [vmem:[#allocation9 + $0x100] sm:$0xff] }
 0x243   : > { %v2503_v54 = vadd.f32 %v929_v52, %v2443_v15  ;;  %v399_v15 = vld [vmem:[#allocation9 + $0x10] sm:$0xff]  ;;  %v432_v52 = vld [vmem:[#allocation9 + $0x118] sm:$0xff] }
 0x245   : > { %v1121_v57 = vpop.permute.xlu1 %1120  ;;  %933 = vrot.lane.b32.xlu1 %v2503_v54, %s2110_s16  ;;  %931 = vrot.lane.b32.xlu0 %v2503_v54, %s2111_s18 }
 0x246   : > { %v1122_v58 = vsel %vm657_vm0, %v1119_v56, %v1121_v57  ;;  %v1676_v57 = vpack.c.bf16 %v432_v52, %v429_v48  ;;  %v638_v48 = vld [vmem:[#allocation11 + $0x8] sm:$0xff] }
 0x247   : > { %v2512_v59 = vadd.f32 %v1122_v58, %v2445_v16  ;;  %v402_v16 = vld [vmem:[#allocation9 + $0x28] sm:$0xff]  ;;  %v435_v58 = vld [vmem:[#allocation9 + $0x130] sm:$0xff] }
 0x248   : > { %v1661_v20 = vpack.c.bf16 %v402_v16, %v399_v15 }
 0x249   : > { %1126 = vrot.lane.b32.xlu1 %v2512_v59, %s2110_s16  ;;  %1124 = vrot.lane.b32.xlu0 %v2512_v59, %s2111_s18  ;;  %s2028_s16 = scalar_lea.vmem %s2027_s27, 768 }
 0x24a   : > { %1662 = vmatpush3.bf16.msra.mxu1 %v1661_v20  ;;  %p2030_p4 = scmp.lt.s32.totalorder %s2028_s16, %s2022_s1 }
 0x24b   : > { %1663 = vmatprep.subr.bf16.mxu1 %v2114_v19 }
 0x24c   : > { %p2031_p13 = por %p2030_p4, %p2029_p11 }
 0x24e   : > { %p2032_p2 = pnand %p2031_p13, %p2025_p9 }
 0x29b   : > { %v668_v60 = vpop.permute.xlu1 %667  ;;  %v666_v61 = vpop.permute.xlu0 %665 }
 0x29c   : > { %v669_v62 = vsel %vm664_vm1, %v666_v61, %v668_v60  ;;  %v438_v60 = vld [vmem:[#allocation9 + $0x148] sm:$0xff] }
 0x29d   : > { %v2521_v63 = vadd.f32 %v669_v62, %v663_v23  ;;  %v1679_v61 = vpack.c.bf16 %v438_v60, %v435_v58  ;;  %v441_v62 = vld [vmem:[#allocation9 + $0x160] sm:$0xff]  ;;  %v639_v60 = vld [vmem:[#allocation11 + $0x10] sm:$0xff] }
 0x29f   : > { %v703_v1 = vpop.permute.xlu1 %702  ;;  %674 = vrot.lane.b32.xlu1 %v2521_v63, %s2112_s8  ;;  %672 = vrot.lane.b32.xlu0 %v2521_v63, %s2113_s23  ;;  %v701_v2 = vpop.permute.xlu0 %700 }
 0x2a0   : > { %v704_v3 = vsel %vm664_vm1, %v701_v2, %v703_v1  ;;  %v444_v1 = vld [vmem:[#allocation9 + $0x178] sm:$0xff] }
 0x2a1   : > { %v2529_v4 = vadd.f32 %v704_v3, %v699_v27  ;;  %v1664_v27 = vpack.c.bf16 %v408_v25, %v405_v24 }
 0x2a3   : > { %v735_v5 = vpop.permute.xlu1 %734  ;;  %708 = vrot.lane.b32.xlu1 %v2529_v4, %s2112_s8  ;;  %706 = vrot.lane.b32.xlu0 %v2529_v4, %s2113_s23  ;;  %v733_v6 = vpop.permute.xlu0 %732 }
 0x2a4   : > { %v736_v7 = vsel %vm664_vm1, %v733_v6, %v735_v5  ;;  %1665 = vmatpush3.bf16.msra.mxu1 %v1664_v27 }
 0x2a5   : > { %v2537_v8 = vadd.f32 %v736_v7, %v731_v31  ;;  %v411_v31 = vld [vmem:[#allocation9 + $0x70] sm:$0xff]  ;;  %1666 = vmatprep.subr.bf16.mxu1 %v2114_v19 }
 0x2a6   : > { %v1667_v34 = vpack.c.bf16 %v414_v32, %v411_v31 }
 0x2a7   : > { %v870_v9 = vpop.permute.xlu1 %869  ;;  %740 = vrot.lane.b32.xlu1 %v2537_v8, %s2112_s8  ;;  %738 = vrot.lane.b32.xlu0 %v2537_v8, %s2113_s23  ;;  %v868_v10 = vpop.permute.xlu0 %867 }
 0x2a8   : > { %v871_v11 = vsel %vm664_vm1, %v868_v10, %v870_v9  ;;  %1668 = vmatpush3.bf16.msra.mxu1 %v1667_v34 }
 0x2a9   : > { %v2545_v12 = vadd.f32 %v871_v11, %v866_v35  ;;  %1669 = vmatprep.subr.bf16.mxu1 %v2114_v19 }
 0x2ab   : > { %v902_v13 = vpop.permute.xlu1 %901  ;;  %875 = vrot.lane.b32.xlu1 %v2545_v12, %s2112_s8  ;;  %873 = vrot.lane.b32.xlu0 %v2545_v12, %s2113_s23  ;;  %v900_v14 = vpop.permute.xlu0 %899 }
 0x2ac   : > { %v903_v17 = vsel %vm664_vm1, %v900_v14, %v902_v13  ;;  %1671 = vmatpush3.bf16.msra.mxu1 %v1670_v38 }
 0x2ad   : > { %v2555_v21 = vadd.f32 %v903_v17, %v898_v39  ;;  %1672 = vmatprep.subr.bf16.mxu1 %v2114_v19 }
 0x2af   : > { %v1063_v22 = vpop.permute.xlu1 %1062  ;;  %907 = vrot.lane.b32.xlu1 %v2555_v21, %s2112_s8  ;;  %905 = vrot.lane.b32.xlu0 %v2555_v21, %s2113_s23  ;;  %v1061_v23 = vpop.permute.xlu0 %1060 }
 0x2b0   : > { %v1064_v26 = vsel %vm664_vm1, %v1061_v23, %v1063_v22  ;;  %1674 = vmatpush3.bf16.msra.mxu1 %v1673_v45 }
 0x2b1   : > { %v2565_v28 = vadd.f32 %v1064_v26, %v2485_v43  ;;  %1675 = vmatprep.subr.bf16.mxu1 %v2114_v19 }
 0x2b3   : > { %v1095_v29 = vpop.permute.xlu1 %1094  ;;  %1068 = vrot.lane.b32.xlu1 %v2565_v28, %s2112_s8  ;;  %1066 = vrot.lane.b32.xlu0 %v2565_v28, %s2113_s23  ;;  %v1093_v30 = vpop.permute.xlu0 %1092 }
 0x2b4   : > { %v1096_v33 = vsel %vm664_vm1, %v1093_v30, %v1095_v29  ;;  %1677 = vmatpush3.bf16.msra.mxu1 %v1676_v57 }
 0x2b5   : > { %v2575_v35 = vadd.f32 %v1096_v33, %v2494_v46  ;;  %1678 = vmatprep.subr.bf16.mxu1 %v2114_v19 }
 0x2b7   : > { %v934_v39 = vpop.permute.xlu1 %933  ;;  %1100 = vrot.lane.b32.xlu1 %v2575_v35, %s2112_s8  ;;  %1098 = vrot.lane.b32.xlu0 %v2575_v35, %s2113_s23  ;;  %v932_v40 = vpop.permute.xlu0 %931 }
 0x2b8   : > { %v935_v43 = vsel %vm664_vm1, %v932_v40, %v934_v39  ;;  %1680 = vmatpush3.bf16.msra.mxu1 %v1679_v61  ;;  %v640_v61 = vld [vmem:[#allocation11 + $0x18] sm:$0xff] }
 0x2b9   : > { %v2589_v44 = vadd.f32 %v935_v43, %v2503_v54  ;;  %1681 = vmatprep.subr.bf16.mxu1 %v2114_v19 }
 0x2bb   : > { %v1127_v46 = vpop.permute.xlu1 %1126  ;;  %939 = vrot.lane.b32.xlu1 %v2589_v44, %s2112_s8  ;;  %937 = vrot.lane.b32.xlu0 %v2589_v44, %s2113_s23  ;;  %v1125_v47 = vpop.permute.xlu0 %1124 }
 0x2bc   : > { %v1128_v56 = vsel %vm664_vm1, %v1125_v47, %v1127_v46  ;;  %v637_v47 = vld [vmem:[#allocation11] sm:$0xff] }
 0x2bd   : > { %v2599_v54 = vadd.f32 %v1128_v56, %v2512_v59  ;;  %v1682_v59 = vpack.c.bf16 %v444_v1, %v441_v62  ;;  %v2709_v56 = vpack.c.bf16 %v638_v48, %v637_v47  ;;  %v2723_v1 = vpack.c.bf16 %v640_v61, %v639_v60 }
 0x2bf   : > { %1132 = vrot.lane.b32.xlu1 %v2599_v54, %s2112_s8  ;;  %1130 = vrot.lane.b32.xlu0 %v2599_v54, %s2113_s23 }
 0x2c0   : > { %1683 = vmatpush3.bf16.msra.mxu1 %v1682_v59  ;;  %1686 = vmatpush3.bf16.msra.mxu0 %v2709_v56 }
 0x2c1   : > { %1708 = vmatprep.subr.bf16.mxu1 %v2114_v19  ;;  %1687 = vmatprep.subr.bf16.mxu0 %v2114_v19 }
 0x2c3   : > { %1515 = vmatmul.mubr.f32.vlgmr.msra.gmra.mrb[0].mxu1 %v2413_v49 }
 0x2c4   : > { %1517 = vmatprep.mubr.msk.f32.mxu1 %vm2115_vm2, %v2107_v0  ;;  %1710 = vmatpush3.bf16.msra.mxu1 %v2709_v56 }
 0x2c5   : > { %1711 = vmatprep.subr.bf16.mxu1 %v2114_v19  ;;  %1689 = vmatpush3.bf16.msra.mxu0 %v2723_v1 }
 0x2c6   : > { %1690 = vmatprep.subr.bf16.mxu0 %v2114_v19 }
 0x2c7   : > { %1518 = vmatmul.mubr.f32.gmra.mrb[2].mxu1 %v2419_v50 }
 0x2c8   : > { %1520 = vmatprep.mubr.msk.f32.mxu1 %vm2115_vm2, %v2107_v0  ;;  %1713 = vmatpush3.bf16.msra.mxu1 %v2723_v1 }
 0x2c9   : > { %1714 = vmatprep.subr.bf16.mxu1 %v2114_v19 }
 0x2cb   : > { %1521 = vmatmul.mubr.f32.gmra.mrb[4].mxu1 %v2425_v51 }
 0x2cc   : > { %1590 = vmatprep.mubr.msk.f32.mxu1 %vm2115_vm2, %v2107_v0 }
 0x311   : > { %v675_v2 = vpop.permute.xlu1 %674  ;;  %v673_v3 = vpop.permute.xlu0 %672 }
 0x312   : > { %v676_v49 = vsel %vm671_vm3, %v673_v3, %v675_v2 }
 0x313   : > { %v677_v5 = vadd.f32 %v676_v49, %v2521_v63  ;;  %v641_v49 = vld [vmem:[#allocation11 + $0x20] sm:$0xff] }
 0x315   : > { %v709_v6 = vpop.permute.xlu1 %708  ;;  %681 = vrot.lane.b32.xlu1 %v677_v5, %s2116_s13  ;;  %679 = vrot.lane.b32.xlu0 %v677_v5, %s2117_s21  ;;  %v707_v50 = vpop.permute.xlu0 %706 }
 0x316   : > { %v710_v51 = vsel %vm671_vm3, %v707_v50, %v709_v6 }
 0x317   : > { %v711_v7 = vadd.f32 %v710_v51, %v2529_v4 }
 0x319   : > { %v741_v9 = vpop.permute.xlu1 %740  ;;  %714 = vrot.lane.b32.xlu1 %v711_v7, %s2116_s13  ;;  %712 = vrot.lane.b32.xlu0 %v711_v7, %s2117_s21  ;;  %v739_v10 = vpop.permute.xlu0 %738 }
 0x31a   : > { %v742_v63 = vsel %vm671_vm3, %v739_v10, %v741_v9  ;;  %v643_v10 = vld [vmem:[#allocation11 + $0x30] sm:$0xff] }
 0x31b   : > { %v743_v11 = vadd.f32 %v742_v63, %v2537_v8  ;;  %v644_v63 = vld [vmem:[#allocation11 + $0x38] sm:$0xff] }
 0x31d   : > { %v876_v13 = vpop.permute.xlu1 %875  ;;  %746 = vrot.lane.b32.xlu1 %v743_v11, %s2116_s13  ;;  %744 = vrot.lane.b32.xlu0 %v743_v11, %s2117_s21  ;;  %v874_v14 = vpop.permute.xlu0 %873 }
 0x31e   : > { %v877_v4 = vsel %vm671_vm3, %v874_v14, %v876_v13  ;;  %v2753_v13 = vpack.c.bf16 %v644_v63, %v643_v10 }
 0x31f   : > { %v2637_v15 = vadd.f32 %v877_v4, %v2545_v12 }
 0x321   : > { %v908_v16 = vpop.permute.xlu1 %907  ;;  %881 = vrot.lane.b32.xlu1 %v2637_v15, %s2116_s13  ;;  %879 = vrot.lane.b32.xlu0 %v2637_v15, %s2117_s21  ;;  %v906_v8 = vpop.permute.xlu0 %905 }
 0x322   : > { %v909_v17 = vsel %vm671_vm3, %v906_v8, %v908_v16  ;;  %v645_v8 = vld [vmem:[#allocation11 + $0x40] sm:$0xff] }
 0x323   : > { %v2646_v20 = vadd.f32 %v909_v17, %v2555_v21  ;;  %v646_v17 = vld [vmem:[#allocation11 + $0x48] sm:$0xff] }
 0x325   : > { %v1069_v22 = vpop.permute.xlu1 %1068  ;;  %913 = vrot.lane.b32.xlu1 %v2646_v20, %s2116_s13  ;;  %911 = vrot.lane.b32.xlu0 %v2646_v20, %s2117_s21  ;;  %v1067_v12 = vpop.permute.xlu0 %1066 }
 0x326   : > { %v1070_v23 = vsel %vm671_vm3, %v1067_v12, %v1069_v22 }
 0x327   : > { %v2655_v24 = vadd.f32 %v1070_v23, %v2565_v28 }
 0x329   : > { %v1101_v25 = vpop.permute.xlu1 %1100  ;;  %1074 = vrot.lane.b32.xlu1 %v2655_v24, %s2116_s13  ;;  %1072 = vrot.lane.b32.xlu0 %v2655_v24, %s2117_s21  ;;  %v1099_v21 = vpop.permute.xlu0 %1098 }
 0x32a   : > { %v1102_v26 = vsel %vm671_vm3, %v1099_v21, %v1101_v25 }
 0x32b   : > { %v2664_v27 = vadd.f32 %v1102_v26, %v2575_v35  ;;  %v647_v26 = vld [vmem:[#allocation11 + $0x50] sm:$0xff] }
 0x32d   : > { %v940_v29 = vpop.permute.xlu1 %939  ;;  %1106 = vrot.lane.b32.xlu1 %v2664_v27, %s2116_s13  ;;  %1104 = vrot.lane.b32.xlu0 %v2664_v27, %s2117_s21  ;;  %v938_v28 = vpop.permute.xlu0 %937 }
 0x32e   : > { %v941_v30 = vsel %vm671_vm3, %v938_v28, %v940_v29 }
 0x32f   : > { %v2673_v31 = vadd.f32 %v941_v30, %v2589_v44 }
 0x331   : > { %v1133_v32 = vpop.permute.xlu1 %1132  ;;  %945 = vrot.lane.b32.xlu1 %v2673_v31, %s2116_s13  ;;  %943 = vrot.lane.b32.xlu0 %v2673_v31, %s2117_s21  ;;  %v1131_v33 = vpop.permute.xlu0 %1130 }
 0x332   : > { %v1134_v34 = vsel %vm671_vm3, %v1131_v33, %v1133_v32 }
 0x333   : > { %v2682_v35 = vadd.f32 %v1134_v34, %v2599_v54 }
 0x335   : > { %1138 = vrot.lane.b32.xlu1 %v2682_v35, %s2116_s13  ;;  %1136 = vrot.lane.b32.xlu0 %v2682_v35, %s2117_s21 }
 0x387   : > { %v682_v36 = vpop.permute.xlu1 %681  ;;  %v680_v37 = vpop.permute.xlu0 %679 }
 0x388   : > { %v683_v38 = vsel %vm678_vm4, %v680_v37, %v682_v36  ;;  %v649_v36 = vld [vmem:[#allocation11 + $0x60] sm:$0xff]  ;;  %v650_v37 = vld [vmem:[#allocation11 + $0x68] sm:$0xff] }
 0x389   : > { %v2691_v39 = vadd.f32 %v683_v38, %v677_v5  ;;  %v642_v5 = vld [vmem:[#allocation11 + $0x28] sm:$0xff]  ;;  %v2803_v38 = vpack.c.bf16 %v650_v37, %v649_v36 }
 0x38a   : > { %v2738_v50 = vpack.c.bf16 %v642_v5, %v641_v49 }
 0x38b   : > { %v715_v40 = vpop.permute.xlu1 %714  ;;  %688 = vrot.lane.b32.xlu1 %v2691_v39, %s2118_s22  ;;  %686 = vrot.lane.b32.xlu0 %v2691_v39, %s2119_s10  ;;  %v713_v41 = vpop.permute.xlu0 %712 }
 0x38c   : > { %v716_v42 = vsel %vm678_vm4, %v713_v41, %v715_v40  ;;  %1692 = vmatpush3.bf16.msra.mxu0 %v2738_v50  ;;  %1716 = vmatpush3.bf16.msra.mxu1 %v2738_v50  ;;  %v651_v41 = vld [vmem:[#allocation11 + $0x70] sm:$0xff] }
 0x38d   : > { %v2699_v43 = vadd.f32 %v716_v42, %v711_v7  ;;  %1693 = vmatprep.subr.bf16.mxu0 %v2114_v19  ;;  %1717 = vmatprep.subr.bf16.mxu1 %v2114_v19  ;;  %v652_v42 = vld [vmem:[#allocation11 + $0x78] sm:$0xff] }
 0x38f   : > { %v747_v44 = vpop.permute.xlu1 %746  ;;  %720 = vrot.lane.b32.xlu1 %v2699_v43, %s2118_s22  ;;  %718 = vrot.lane.b32.xlu0 %v2699_v43, %s2119_s10  ;;  %v745_v45 = vpop.permute.xlu0 %744 }
 0x390   : > { %v748_v46 = vsel %vm678_vm4, %v745_v45, %v747_v44  ;;  %1695 = vmatpush3.bf16.msra.mxu0 %v2753_v13  ;;  %1719 = vmatpush3.bf16.msra.mxu1 %v2753_v13  ;;  %v2815_v44 = vpack.c.bf16 %v652_v42, %v651_v41 }
 0x391   : > { %v2707_v52 = vadd.f32 %v748_v46, %v743_v11  ;;  %1696 = vmatprep.subr.bf16.mxu0 %v2114_v19  ;;  %1720 = vmatprep.subr.bf16.mxu1 %v2114_v19 }
 0x393   : > { %v882_v54 = vpop.permute.xlu1 %881  ;;  %752 = vrot.lane.b32.xlu1 %v2707_v52, %s2118_s22  ;;  %750 = vrot.lane.b32.xlu0 %v2707_v52, %s2119_s10  ;;  %v880_v57 = vpop.permute.xlu0 %879 }
 0x394   : > { %v883_v58 = vsel %vm678_vm4, %v880_v57, %v882_v54 }
 0x395   : > { %v2720_v62 = vadd.f32 %v883_v58, %v2637_v15 }
 0x397   : > { %v914_v59 = vpop.permute.xlu1 %913  ;;  %887 = vrot.lane.b32.xlu1 %v2720_v62, %s2118_s22  ;;  %885 = vrot.lane.b32.xlu0 %v2720_v62, %s2119_s10  ;;  %v912_v2 = vpop.permute.xlu0 %911 }
 0x398   : > { %v915_v3 = vsel %vm678_vm4, %v912_v2, %v914_v59 }
 0x399   : > { %v2735_v6 = vadd.f32 %v915_v3, %v2646_v20  ;;  %v2769_v20 = vpack.c.bf16 %v646_v17, %v645_v8 }
 0x39b   : > { %v1075_v51 = vpop.permute.xlu1 %1074  ;;  %919 = vrot.lane.b32.xlu1 %v2735_v6, %s2118_s22  ;;  %917 = vrot.lane.b32.xlu0 %v2735_v6, %s2119_s10  ;;  %v1073_v7 = vpop.permute.xlu0 %1072 }
 0x39c   : > { %v1076_v9 = vsel %vm678_vm4, %v1073_v7, %v1075_v51  ;;  %1698 = vmatpush3.bf16.msra.mxu0 %v2769_v20  ;;  %1722 = vmatpush3.bf16.msra.mxu1 %v2769_v20 }
 0x39d   : > { %v2750_v11 = vadd.f32 %v1076_v9, %v2655_v24  ;;  %v2777_v24 = vpop.f32.mrb[0].mxu1  ;;  %1699 = vmatprep.subr.bf16.mxu0 %v2114_v19  ;;  %1723 = vmatprep.subr.bf16.mxu1 %v2114_v19 }
 0x39e   : > { %v1516_v21 = vpop.f32.mrb[1].mxu1 }
 0x39f   : > { %v1107_v14 = vpop.permute.xlu1 %1106  ;;  %1080 = vrot.lane.b32.xlu1 %v2750_v11, %s2118_s22  ;;  %1078 = vrot.lane.b32.xlu0 %v2750_v11, %s2119_s10  ;;  %v1105_v4 = vpop.permute.xlu0 %1104 }
 0x3a0   : > { %v1108_v15 = vsel %vm678_vm4, %v1105_v4, %v1107_v14  ;;  %v2794_v32 = vpop.f32.mrb[2].mxu1 }
 0x3a1   : > { %v2765_v16 = vadd.f32 %v1108_v15, %v2664_v27  ;;  %v648_v27 = vld [vmem:[#allocation11 + $0x58] sm:$0xff]  ;;  %v1519_v34 = vpop.f32.mrb[3].mxu1 }
 0x3a2   : > { %v2786_v29 = vpack.c.bf16 %v648_v27, %v647_v26  ;;  %v2809_v40 = vpop.f32.mrb[4].mxu1 }
 0x3a3   : > { %v946_v22 = vpop.permute.xlu1 %945  ;;  %1112 = vrot.lane.b32.xlu1 %v2765_v16, %s2118_s22  ;;  %1110 = vrot.lane.b32.xlu0 %v2765_v16, %s2119_s10  ;;  %v944_v12 = vpop.permute.xlu0 %943 }
 0x3a4   : > { %v947_v23 = vsel %vm678_vm4, %v944_v12, %v946_v22  ;;  %1701 = vmatpush3.bf16.msra.mxu0 %v2786_v29  ;;  %1725 = vmatpush3.bf16.msra.mxu1 %v2786_v29 }
 0x3a5   : > { %v2782_v25 = vadd.f32 %v947_v23, %v2673_v31  ;;  %1702 = vmatprep.subr.bf16.mxu0 %v2114_v19  ;;  %1726 = vmatprep.subr.bf16.mxu1 %v2114_v19 }
 0x3a7   : > { %v1139_v28 = vpop.permute.xlu1 %1138  ;;  %951 = vrot.lane.b32.xlu1 %v2782_v25, %s2118_s22  ;;  %949 = vrot.lane.b32.xlu0 %v2782_v25, %s2119_s10  ;;  %v1137_v30 = vpop.permute.xlu0 %1136 }
 0x3a8   : > { %v1140_v31 = vsel %vm678_vm4, %v1137_v30, %v1139_v28  ;;  %1704 = vmatpush3.bf16.msra.mxu0 %v2803_v38  ;;  %1728 = vmatpush3.bf16.msra.mxu1 %v2803_v38 }
 0x3a9   : > { %v2799_v33 = vadd.f32 %v1140_v31, %v2682_v35  ;;  %v1522_v35 = vpop.f32.mrb[5].mxu1  ;;  %1705 = vmatprep.subr.bf16.mxu0 %v2114_v19  ;;  %1729 = vmatprep.subr.bf16.mxu1 %v2114_v19 }
 0x3ab   : > { %1144 = vrot.lane.b32.xlu1 %v2799_v33, %s2118_s22  ;;  %1142 = vrot.lane.b32.xlu0 %v2799_v33, %s2119_s10 }
 0x3ac   : > { %1707 = vmatpush3.bf16.msra.mxu0 %v2815_v44  ;;  %1731 = vmatpush3.bf16.msra.mxu1 %v2815_v44 }
 0x3ad   : > { %1732 = vmatprep.subr.bf16.mxu0 %v2114_v19 }
 0x3fd   : > { %v689_v45 = vpop.permute.xlu1 %688  ;;  %v687_v46 = vpop.permute.xlu0 %686 }
 0x3fe   : > { %v690_v54 = vsel %vm685_vm5, %v687_v46, %v689_v45 }
 0x3ff   : > { %v691_v60 = vadd.f32 %v690_v54, %v2691_v39 }
 0x401   : > { %v721_v47 = vpop.permute.xlu1 %720  ;;  %v719_v48 = vpop.permute.xlu0 %718 }
 0x402   : > { %v722_v57 = vsel %vm685_vm5, %v719_v48, %v721_v47 }
 0x403   : > { %v723_v58 = vadd.f32 %v722_v57, %v2699_v43 }
 0x405   : > { %v753_v61 = vpop.permute.xlu1 %752  ;;  %v751_v59 = vpop.permute.xlu0 %750  ;;  %v756_v3 = vmax.f32 %v691_v60, %v723_v58 }
 0x406   : > { %v754_v2 = vsel %vm685_vm5, %v751_v59, %v753_v61 }
 0x407   : > { %v755_v49 = vadd.f32 %v754_v2, %v2707_v52 }
 0x409   : > { %v757_v5 = vmax.f32 %v756_v3, %v755_v49  ;;  %v888_v51 = vpop.permute.xlu1 %887  ;;  %v886_v7 = vpop.permute.xlu0 %885 }
 0x40a   : > { %v889_v23 = vsel %vm685_vm5, %v886_v7, %v888_v51 }
 0x40b   : > { %v758_v9 = vsub.f32 %v691_v60, %v757_v5  ;;  %v761_v10 = vsub.f32 %v723_v58, %v757_v5  ;;  %v764_v63 = vsub.f32 %v755_v49, %v757_v5  ;;  %v890_v27 = vadd.f32 %v889_v23, %v2720_v62 }
 0x40d   : > { %v759_v14 = vmul.f32 1.442695, %v758_v9  ;;  %v762_v4 = vmul.f32 1.442695, %v761_v10  ;;  %v920_v15 = vpop.permute.xlu1 %919  ;;  %v918_v43 = vpop.permute.xlu0 %917  ;;  %v765_v8 = vmul.f32 1.442695, %v764_v63 }
 0x40e   : > { %v921_v22 = vsel %vm685_vm5, %v918_v43, %v920_v15 }
 0x40f   : > { %1852 = vpow2.f32 %v759_v14  ;;  %v922_v21 = vadd.f32 %v921_v22, %v2735_v6 }
 0x410   : > { %1854 = vpow2.f32 %v762_v4 }
 0x411   : > { %v1081_v39 = vpop.permute.xlu1 %1080  ;;  %v1079_v17 = vpop.permute.xlu0 %1078  ;;  %1856 = vpow2.f32 %v765_v8  ;;  %v955_v35 = vmax.f32 %v890_v27, %v922_v21 }
 0x412   : > { %v1082_v41 = vsel %vm685_vm5, %v1079_v17, %v1081_v39 }
 0x413   : > { %v1083_v54 = vadd.f32 %v1082_v41, %v2750_v11 }
 0x415   : > { %v1113_v52 = vpop.permute.xlu1 %1112  ;;  %v1111_v12 = vpop.permute.xlu0 %1110 }
 0x416   : > { %v1114_v28 = vsel %vm685_vm5, %v1111_v12, %v1113_v52 }
 0x417   : > { %v1115_v45 = vadd.f32 %v1114_v28, %v2765_v16  ;;  %v457_v16 = vsub.s32 2, %v2428_v53 }
 0x419   : > { %v1853_v26 = vpop.eup %1852  ;;  %v952_v30 = vpop.permute.xlu1 %951  ;;  %v1148_v59 = vmax.f32 %v1083_v54, %v1115_v45  ;;  %v458_v18 = vrot.slane %v2434_v55, %v457_v16 }
 0x41a   : > { %v950_v31 = vpop.permute.xlu0 %949  ;;  %v1855_v34 = vpop.eup %1854 }
 0x41b   : > { %v953_v36 = vsel %vm685_vm5, %v950_v31, %v952_v30  ;;  %v767_v37 = vadd.f32 %v1855_v34, %v1853_v26  ;;  %v1857_v6 = vpop.eup %1856  ;;  %v617_v53 = vadd.f32 %v2794_v32, %v458_v18  ;;  %v622_v43 = vadd.f32 %v2809_v40, %v458_v18 }
 0x41c   : > { %v954_v42 = vadd.f32 %v953_v36, %v2782_v25 }
 0x41d   : > { %v768_v62 = vadd.f32 %v1857_v6, %v767_v37  ;;  %v1145_v47 = vpop.permute.xlu1 %1144 }
 0x41e   : > { %v956_v46 = vmax.f32 %v955_v35, %v954_v42  ;;  %v1143_v48 = vpop.permute.xlu0 %1142 }
 0x41f   : > { %v1146_v57 = vsel %vm685_vm5, %v1143_v48, %v1145_v47  ;;  %1858 = vrcp.f32 %v768_v62 }
 0x420   : > { %v957_v58 = vsub.f32 %v890_v27, %v956_v46  ;;  %v960_v60 = vsub.f32 %v922_v21, %v956_v46  ;;  %v963_v61 = vsub.f32 %v954_v42, %v956_v46  ;;  %v1147_v2 = vadd.f32 %v1146_v57, %v2799_v33 }
 0x421   : > { %v612_v33 = vadd.f32 %v2777_v24, %v458_v18 }
 0x422   : > { %v958_v25 = vmul.f32 1.442695, %v957_v58  ;;  %v961_v3 = vmul.f32 1.442695, %v960_v60  ;;  %v964_v49 = vmul.f32 1.442695, %v963_v61  ;;  %v1149_v5 = vmax.f32 %v1148_v59, %v1147_v2 }
 0x424   : > { %1860 = vpow2.f32 %v958_v25  ;;  %v1150_v51 = vsub.f32 %v1083_v54, %v1149_v5  ;;  %v1153_v11 = vsub.f32 %v1115_v45, %v1149_v5  ;;  %v1156_v7 = vsub.f32 %v1147_v2, %v1149_v5 }
 0x425   : > { %1862 = vpow2.f32 %v961_v3 }
 0x426   : > { %1864 = vpow2.f32 %v964_v49  ;;  %v1151_v9 = vmul.f32 1.442695, %v1150_v51  ;;  %v1154_v10 = vmul.f32 1.442695, %v1153_v11  ;;  %v1157_v63 = vmul.f32 1.442695, %v1156_v7 }
 0x428   : > { %1866 = vpow2.f32 %v1151_v9 }
 0x429   : > { %v1859_v14 = vpop.eup %1858  ;;  %1868 = vpow2.f32 %v1154_v10 }
 0x42a   : > { %v770_v4 = vmul.f32 %v1859_v14, %v1853_v26  ;;  %v773_v15 = vmul.f32 %v1859_v14, %v1855_v34  ;;  %v777_v8 = vmul.f32 %v1859_v14, %v1857_v6  ;;  %1870 = vpow2.f32 %v1157_v63 }
 0x42c   : > { %v772_v39 = vmul.f32 %v770_v4, %v612_v33  ;;  %v775_v17 = vmul.f32 %v773_v15, %v617_v53  ;;  %v779_v12 = vmul.f32 %v777_v8, %v622_v43 }
 0x42e   : > { %v1861_v55 = vpop.eup %1860  ;;  %v776_v52 = vadd.f32 %v775_v17, %v772_v39 }
 0x42f   : > { %v1863_v22 = vpop.eup %1862 }
 0x430   : > { %v966_v23 = vadd.f32 %v1863_v22, %v1861_v55  ;;  %v1865_v21 = vpop.eup %1864  ;;  %v780_v27 = vadd.f32 %v779_v12, %v776_v52 }
 0x432   : > { %v967_v28 = vadd.f32 %v1865_v21, %v966_v23  ;;  %v1867_v30 = vpop.eup %1866  ;;  %1556 = vmatmul.mubr.f32.vlgmr.msra.gmra.mrb[6].mxu0 %v780_v27 }
 0x433   : > { %v1869_v24 = vpop.eup %1868  ;;  %1734 = vmatpush3.bf16.msra.mxu0 %v2709_v56  ;;  %1625 = vmatprep.mubr.msk.f32.mxu0 %vm2115_vm2, %v2107_v0 }
 0x434   : > { %1872 = vrcp.f32 %v967_v28  ;;  %v1159_v32 = vadd.f32 %v1869_v24, %v1867_v30  ;;  %1735 = vmatprep.subr.bf16.mxu0 %v2114_v19  ;;  %v1871_v40 = vpop.eup %1870 }
 0x436   : > { %v1160_v26 = vadd.f32 %v1871_v40, %v1159_v32 }
 0x437   : > { %1737 = vmatpush3.bf16.msra.mxu0 %v2723_v1 }
 0x438   : > { %1874 = vrcp.f32 %v1160_v26  ;;  %1738 = vmatprep.subr.bf16.mxu0 %v2114_v19 }
 0x43b   : > { %1740 = vmatpush3.bf16.msra.mxu0 %v2738_v50 }
 0x43c   : > { %1741 = vmatprep.subr.bf16.mxu0 %v2114_v19 }
 0x43e   : > { %v1873_v31 = vpop.eup %1872 }
 0x43f   : > { %v969_v34 = vmul.f32 %v1873_v31, %v1861_v55  ;;  %v972_v56 = vmul.f32 %v1873_v31, %v1863_v22  ;;  %v976_v36 = vmul.f32 %v1873_v31, %v1865_v21  ;;  %1743 = vmatpush3.bf16.msra.mxu0 %v2753_v13 }
 0x440   : > { %1744 = vmatprep.subr.bf16.mxu0 %v2114_v19 }
 0x441   : > { %v971_v0 = vmul.f32 %v969_v34, %v612_v33  ;;  %v974_v37 = vmul.f32 %v972_v56, %v617_v53  ;;  %v978_v1 = vmul.f32 %v976_v36, %v622_v43 }
 0x442   : > { %v1875_v35 = vpop.eup %1874 }
 0x443   : > { %v975_v41 = vadd.f32 %v974_v37, %v971_v0  ;;  %v1162_v42 = vmul.f32 %v1875_v35, %v1867_v30  ;;  %v1165_v6 = vmul.f32 %v1875_v35, %v1869_v24  ;;  %v1169_v45 = vmul.f32 %v1875_v35, %v1871_v40  ;;  %1746 = vmatpush3.bf16.msra.mxu0 %v2769_v20  ;;  %v1408_v20 = vld [vmem:[%s2928_s6] ss:$0 sm:$0xff] }
 0x444   : > { %1747 = vmatprep.subr.bf16.mxu0 %v2114_v19 }
 0x445   : > { %v979_v50 = vadd.f32 %v978_v1, %v975_v41  ;;  %v1164_v62 = vmul.f32 %v1162_v42, %v612_v33  ;;  %v1167_v46 = vmul.f32 %v1165_v6, %v617_v53  ;;  %v1171_v47 = vmul.f32 %v1169_v45, %v622_v43 }
 0x447   : > { %1591 = vmatmul.mubr.f32.vlgmr.msra.gmra.mrb[6].mxu1 %v979_v50  ;;  %v1168_v13 = vadd.f32 %v1167_v46, %v1164_v62  ;;  %1749 = vmatpush3.bf16.msra.mxu0 %v2786_v29 }
 0x448   : > { %1750 = vmatprep.subr.bf16.mxu0 %v2114_v19 }
 0x449   : > { %v1172_v48 = vadd.f32 %v1171_v47, %v1168_v13 }
 0x44b   : > { %1752 = vmatpush3.bf16.msra.mxu0 %v2803_v38 }
 0x44c   : > { %1753 = vmatprep.subr.bf16.mxu0 %v2114_v19 }
 0x44f   : > { %1755 = vmatpush3.bf16.msra.mxu0 %v2815_v44 }
 0x452   : > { %1626 = vmatmul.mubr.f32.vlgmr.msra.gmra.mrb[8].mxu0 %v1172_v48 }
 0x505   : > { %v853_v54 = vpop.f32.mrb[6].mxu0 }
 0x506   : > { %v854_v57 = vadd.f32 %v1408_v20, %v853_v54  ;;  %v1557_v29 = vpop.f32.mrb[7].mxu0 }
 0x508   : > { %857 = vst [vmem:[%s393_s29] sm:$0xff] %v854_v57 }
 0x51a   : > { %v1046_v58 = vpop.f32.mrb[6].mxu1 }
 0x51b   : > { %v1047_v60 = vadd.f32 %v1408_v20, %v1046_v58  ;;  %v1592_v38 = vpop.f32.mrb[7].mxu1 }
 0x51d   : > { %1050 = vst [vmem:[%s393_s29 + $0x8] sm:$0xff] %v1047_v60 }
 0x525   : > { %v1239_v19 = vpop.f32.mrb[8].mxu0 }
 0x526   : > { %v1240_v44 = vadd.f32 %v1408_v20, %v1239_v19  ;;  %v1627_v61 = vpop.f32.mrb[9].mxu0 }
 0x528   : > { %1243 = vst [vmem:[%s393_s29 + $0x10] sm:$0xff] %v1240_v44 }
 0x529   : > { %2035 = shalt.err (!%p2032_p2)
}
 0x52a   : > { %s2036_s3 = scalar_lea.hbm %s2878_s30, 384  ;;  %s2040_s23 = scalar_lea.hbm %s2929_s7, 768 }
 0x52b   : > { %p2037_p5 = scmp.ne.s32.totalorder %s2878_s30, %s2036_s3  ;;  %p2041_p0 = scmp.lt.u32.totalorder %s2878_s30, %s2929_s7 }
 0x52c   : > { %p2042_p7 = scmp.lt.u32.totalorder %s2040_s23, %s2036_s3  ;;  %p2044_p6 = scmp.lt.u32.totalorder %s2036_s3, %s2878_s30 }
 0x52d   : > { %p2038_p12 = pnand %p2037_p5, %p2975_p10 }
 0x52e   : > { %p2043_p1 = por %p2042_p7, %p2041_p0 }
 0x52f   : > { %p2039_p3 = pneg %p2038_p12 }
 0x530   : > { %p2045_p8 = por %p2044_p6, %p2043_p1 }
 0x532   : > { %p2046_p9 = pnand %p2045_p8, %p2039_p3 }
 0x534   : > { %2049 = shalt.err (!%p2046_p9)
}
 0x535   : > { %1772 = dma.vmem_to_hbm [thread:$0]  (%p2975_p10), %s2880_s11, 384, %s2878_s30, %s1245_s20  }
 0x536 PF: > { %s2976_s22 = sld [smem:[#allocation17_spill]]  ;;  %s2977_s10 = sld [smem:[#allocation19_spill]] }
 0x537   : > { %s2978_s15 = sld [smem:[#allocation18_spill]] }
 0x53c   : > { %s1271_s14 = sand.u32 1, %s2976_s22   ;;  %p2979_p11 = scmp.ne.s32.totalorder %s2977_s10, 0 }
 0x53d   : > { %p2980_p4 = scmp.ge.s32.totalorder %s2978_s15, 2  ;;  %s1272_s24 = scalar_lea.sflag [#allocation5], %s1271_s14 }
 0x53f   : > { %p1792_p13 = pnand %p2980_p4, %p2979_p11 }
 0x541   : > { %2079 = dma.done.wait (!%p1792_p13), %s1272_s24, 384  }
 0x542   : > { %2081 = vsyncadd (!%p1792_p13), %s1272_s24, 4294966912  ;;  %s2981_s27 = sld [smem:[#allocation20_spill]]  ;;  %s2982_s29 = sld [smem:[#allocation21_spill]] }
 0x543   : > { %s2983_s24 = smov %s2088_s25  ;;  %s2984_s25 = smov %s2092_s26 }
 0x548   : > { %p24_p2 = scmp.ge.s32.totalorder %s2981_s27, 4   ;;  %s2985_s26 = smov %s2982_s29 }
 0x54a   :  { %26 = sbr.rel (!%p24_p2) target bundleno = 11 (0xb), region = 125 }
 0x551   :  { %1277 = vsyncpa [#allocation4], 1 }
 0x552   :  { %1279 = vsyncpa [#allocation4 + $0x1], 1 }
 0x553   :  { %1280 = vsyncpa [#allocation7], 1 }
 0x554   :  { %1282 = vsyncpa [#allocation7 + $0x1], 1 }
 0x555   :  { %1283 = vsyncpa [#allocation10], 1 }
 0x556   :  { %1284 = vsyncpa [#allocation5], 1 }
 0x557   :  { %1286 = vsyncpa [#allocation5 + $0x1], 1 }

</bundles_post_ra>
